<compile_context>
chip_gen: v6e
topology: v6e:2x2x1
jax: 0.10.0
libtpu: 0.0.40
codegen_flags: <defaults>
</compile_context>

<pallas_src>
import jax
import jax.numpy as jnp
from jax.experimental import pallas as pl
from jax.experimental.pallas import tpu as pltpu

KERNEL_SIZES = (3, 4, 5)
K_MAX = max(KERNEL_SIZES)
C_LANES = 128          # class-score lane padding for dense stores
ROW_TARGET = 2048      # target batch*time rows per grid step (amortize step overhead)
ROW_CAP = 8192         # keep f32 intermediates well inside v7x's 32 MiB scoped VMEM


def _round_up(x, m):
    return (x + m - 1) // m * m


def _cnn_text_kernel(ids_ref, tcat_ref, bconv_ref, mask_ref, wfc_ref, bfc_ref,
                     out_ref):
    """One grid step = one tile of TB sentences (rows = TB * L slab rows).

    ids_ref   : (rows, K_MAX) int32     shifted ids, ids[r, tau] = flat_id[r + tau]
                                        (reads past sentence ends; masked later)
    tcat_ref  : (K_MAX*V_pad, 3F) bf16  embedding folded into per-tap conv weights
    bconv_ref : (1, 3F) f32
    mask_ref  : (L, 3F) f32             1.0 where time t is valid for that filter
                                        group's kernel size, else 0.0
    wfc_ref   : (3F, C_LANES) bf16
    bfc_ref   : (1, C_LANES) f32
    out_ref   : (TB, C_LANES) f32
    """
    rows, kmax = ids_ref.shape
    tb = out_ref.shape[0]
    L = mask_ref.shape[0]
    kv, FT = tcat_ref.shape
    v_pad = kv // kmax

    # ---- one-hot slab of shifted ids: (rows, K_MAX*V_pad), 128-lane aligned ----
    ids = ids_ref[...]
    viota = jax.lax.broadcasted_iota(jnp.int32, (rows, v_pad), 1)
    onehot = jnp.concatenate(
        [(viota == ids[:, tau:tau + 1]).astype(jnp.bfloat16) for tau in range(kmax)],
        axis=1)                                                  # (rows, K_MAX*V_pad)

    # ---- embedding lookup + all three convs in ONE MXU dot ---------------------
    conv = jnp.dot(onehot, tcat_ref[...],
                   preferred_element_type=jnp.float32)           # (rows, 3F)
    conv = jnp.maximum(conv + bconv_ref[...], 0.0)               # bias + ReLU (>= 0)

    # ---- fused mask + max-pool over time (single where-free pass) --------------
    # Post-ReLU values are >= 0, so multiplying invalid tail positions by 0 is exact.
    conv = conv.reshape(tb, L, FT) * mask_ref[...]
    feats = jnp.max(conv, axis=1)                                # (tb, 3F)

    # ---- fc (dropout is identity at inference) ---------------------------------
    scores = jnp.dot(feats.astype(jnp.bfloat16), wfc_ref[...],
                     preferred_element_type=jnp.float32) + bfc_ref[...]
    out_ref[...] = scores.astype(out_ref.dtype)                  # (tb, C_LANES)


def cnn_text_forward(sents, params):
    """sents: (B, L) int32 token ids.  Returns (B, C) class scores (f32)."""
    B, L = sents.shape
    assert L >= K_MAX, "sentence_len must be >= max kernel size"

    embed = params["embed"]                        # (V, E) f32
    conv_w = params["conv_w"]                      # list of (F, E, k)  (PyTorch layout)
    conv_b = params["conv_b"]                      # list of (F,)
    fc_w, fc_b = params["fc_w"], params["fc_b"]    # (C, 3F), (C,)
    V, E = embed.shape
    F = conv_w[0].shape[0]
    C = fc_b.shape[0]
    n_ks = len(KERNEL_SIZES)
    FT = n_ks * F

    # --- parameter prep (tiny, plain JAX) ---------------------------------------
    V_pad = _round_up(V, 128)
    embed_p = jnp.zeros((V_pad, E), jnp.float32).at[:V].set(embed.astype(jnp.float32))

    # Per-tap conv weight, zero beyond each kernel size:
    #   w_tap[tau, e, j*F + f] = conv_w[j][f, e, tau]   for tau < kernel_sizes[j]
    w_tap = jnp.zeros((K_MAX, E, FT), jnp.float32)
    for j, k in enumerate(KERNEL_SIZES):
        w_j = jnp.transpose(conv_w[j], (2, 1, 0)).astype(jnp.float32)    # (k, E, F)
        w_tap = w_tap.at[:k, :, j * F:(j + 1) * F].set(w_j)
    # Fold the embedding table into the conv taps (f32 contraction, one bf16 cast).
    t_cat = jnp.einsum("ve,tec->tvc", embed_p, w_tap)                    # (K_MAX, V_pad, 3F)
    t_cat = t_cat.reshape(K_MAX * V_pad, FT).astype(jnp.bfloat16)
    b_all = jnp.concatenate(conv_b).reshape(1, FT).astype(jnp.float32)

    # Multiplicative time mask: valid conv positions for kernel size k are t <= L - k.
    t_idx = jnp.arange(L)[:, None]                                       # (L, 1)
    mask = jnp.concatenate(
        [jnp.broadcast_to((t_idx <= (L - k)).astype(jnp.float32), (L, F))
         for k in KERNEL_SIZES], axis=1)                                 # (L, 3F)

    # PyTorch flatten order is feats[:, f*n_ks + j]; ours is j*F + f -> rearrange fc_w.
    wfc = fc_w.reshape(C, F, n_ks)
    wfc_cat = jnp.concatenate([wfc[:, :, j].T for j in range(n_ks)], axis=0)  # (3F, C)
    wfc_all = jnp.zeros((FT, C_LANES), jnp.bfloat16).at[:, :C].set(
        wfc_cat.astype(jnp.bfloat16))
    bfc_p = jnp.zeros((1, C_LANES), jnp.float32).at[0, :C].set(fc_b.astype(jnp.float32))

    # --- batch tiling ------------------------------------------------------------
    tb = _round_up(max(1, ROW_TARGET // L), 8)          # ~2048 batch*time rows/step
    tb = min(tb, max(8, (ROW_CAP // L) // 8 * 8))       # rows cap (v7x 64 MiB VMEM)
    b8 = _round_up(B, 8)
    tb = min(tb, b8)                                    # don't over-pad tiny batches
    if b8 >= 16 and b8 <= tb:                           # >= 2 grid steps for v7x's 2 TCs
        tb = max(8, _round_up(pl.cdiv(B, 2), 8))
    B_pad = _round_up(B, tb)
    rows = tb * L

    # Shifted ids: ids_sh[r, tau] = flat_id[r + tau] (zero past the end).  Shifts that
    # cross a sentence boundary only feed conv positions that the mask zeros.
    ids_flat = jnp.pad(sents.astype(jnp.int32), ((0, B_pad - B), (0, 0))).reshape(-1)
    ids_flat = jnp.concatenate([ids_flat, jnp.zeros((K_MAX - 1,), jnp.int32)])
    ids_sh = jnp.stack([ids_flat[t:t + B_pad * L] for t in range(K_MAX)], axis=1)

    out = pl.pallas_call(
        _cnn_text_kernel,
        out_shape=jax.ShapeDtypeStruct((B_pad, C_LANES), jnp.float32),
        grid=(B_pad // tb,),
        in_specs=[
            pl.BlockSpec((rows, K_MAX), lambda b: (b, 0)),
            pl.BlockSpec((K_MAX * V_pad, FT), lambda b: (0, 0)),
            pl.BlockSpec((1, FT), lambda b: (0, 0)),
            pl.BlockSpec((L, FT), lambda b: (0, 0)),
            pl.BlockSpec((FT, C_LANES), lambda b: (0, 0)),
            pl.BlockSpec((1, C_LANES), lambda b: (0, 0)),
        ],
        out_specs=pl.BlockSpec((tb, C_LANES), lambda b: (b, 0)),
        compiler_params=pltpu.CompilerParams(
            dimension_semantics=("parallel",),
            vmem_limit_bytes=32 * 1024 * 1024),
    )(ids_sh, t_cat, b_all, mask, wfc_all, bfc_p)
    return out[:B, :C]


def reference_forward(sents, params):
    """Pure-JAX f32 reference matching the PyTorch forward exactly (eval mode)."""
    emb = jnp.take(params["embed"], sents, axis=0)           # (B, L, E)
    x = jnp.transpose(emb, (0, 2, 1))                        # (B, E, L) == NCL
    B, E, L = x.shape
    F = params["conv_w"][0].shape[0]
    pooled = []
    for j, k in enumerate(KERNEL_SIZES):
        w = params["conv_w"][j]                              # (F, E, k)
        L_out = L - k + 1
        cols = [jnp.einsum('bek,fek->bf', x[:, :, t:t + k], w) for t in range(L_out)]
        conv = jnp.stack(cols, axis=-1) + params["conv_b"][j].reshape(1, F, 1)
        conv = jnp.maximum(conv, 0.0)
        pooled.append(jnp.max(conv, axis=-1, keepdims=True))  # (B, F, 1)
    out = jnp.concatenate(pooled, axis=2)                    # (B, F, 3)
    feats = out.reshape(B, -1)                               # (B, 3F), f-major
    return feats @ params["fc_w"].T + params["fc_b"]


def make_params(key, vocab_size, pad_idx, E, F, C):
    ks = jax.random.split(key, 2 + 2 * len(KERNEL_SIZES) + 2)
    i = 0
    embed = 0.1 * jax.random.normal(ks[i], (vocab_size, E), jnp.float32); i += 1
    embed = embed.at[pad_idx].set(0.0)                       # padding_idx row is zero
    conv_w, conv_b = [], []
    for k in KERNEL_SIZES:
        conv_w.append(0.1 * jax.random.normal(ks[i], (F, E, k), jnp.float32)); i += 1
        conv_b.append(0.1 * jax.random.normal(ks[i], (F,), jnp.float32)); i += 1
    fc_w = 0.1 * jax.random.normal(ks[i], (C, F * len(KERNEL_SIZES)), jnp.float32); i += 1
    fc_b = 0.1 * jax.random.normal(ks[i], (C,), jnp.float32); i += 1
    return dict(embed=embed, conv_w=conv_w, conv_b=conv_b, fc_w=fc_w, fc_b=fc_b)


if __name__ == "__main__":
    key = jax.random.PRNGKey(0)
    vocab_size = 50
    pad_idx = 0
    sentence_len = 16     # L
    emb_dim = 32          # E
    num_filters = 128     # F
    num_classes = 8       # C (targetset size)
    batch = 2

    pkey, skey = jax.random.split(key)
    params = make_params(pkey, vocab_size, pad_idx, emb_dim, num_filters, num_classes)
    sents = jax.random.randint(skey, (batch, sentence_len), 0, vocab_size, dtype=jnp.int32)

    out = jax.block_until_ready(cnn_text_forward(sents, params))
    ref = jax.block_until_ready(reference_forward(sents, params))

    assert out.shape == (batch, num_classes)
    assert jnp.allclose(out, ref, rtol=2e-2, atol=2e-2), (out, ref)

    print("KERNEL_OK")
</pallas_src>

<mosaic_0001>
module attributes {stable_mosaic.version = 11 : i64} {
  func.func @_cnn_text_kernel(%arg0: i32, %arg1: memref<128x5xi32, #tpu.memory_space<vmem>>, %arg2: memref<640x384xbf16, #tpu.memory_space<vmem>>, %arg3: memref<1x384xf32, #tpu.memory_space<vmem>>, %arg4: memref<16x384xf32, #tpu.memory_space<vmem>>, %arg5: memref<384x128xbf16, #tpu.memory_space<vmem>>, %arg6: memref<1x128xf32, #tpu.memory_space<vmem>>, %arg7: memref<8x128xf32, #tpu.memory_space<vmem>>) attributes {dimension_semantics = [#tpu.dimension_semantics<parallel>], iteration_bounds = array<i64: 1>, scalar_prefetch = 0 : i64, scratch_operands = 0 : i64, tpu.core_type = #tpu.core_type<tc>, window_params = [{transform_indices = @transform_0, window_bounds = array<i64: 128, 5>}, {pipeline_mode = #tpu.pipeline_mode<synchronous>, transform_indices = @transform_1, window_bounds = array<i64: 640, 384>}, {pipeline_mode = #tpu.pipeline_mode<synchronous>, transform_indices = @transform_2, window_bounds = array<i64: 1, 384>}, {pipeline_mode = #tpu.pipeline_mode<synchronous>, transform_indices = @transform_3, window_bounds = array<i64: 16, 384>}, {pipeline_mode = #tpu.pipeline_mode<synchronous>, transform_indices = @transform_4, window_bounds = array<i64: 384, 128>}, {pipeline_mode = #tpu.pipeline_mode<synchronous>, transform_indices = @transform_5, window_bounds = array<i64: 1, 128>}, {transform_indices = @transform_6, window_bounds = array<i64: 8, 128>}]} {
    %c0 = arith.constant 0 : index
    %c0_0 = arith.constant 0 : index
    %0 = vector.load %arg1[%c0, %c0_0] : memref<128x5xi32, #tpu.memory_space<vmem>>, vector<128x5xi32>
    %1 = tpu.iota {dimensions = array<i32: 1>} : vector<128x128xi32>
    %2 = vector.extract_strided_slice %0 {offsets = [0, 0], sizes = [128, 1], strides = [1, 1]} : vector<128x5xi32> to vector<128x1xi32>
    %3 = vector.broadcast %2 : vector<128x1xi32> to vector<128x128xi32>
    %4 = arith.cmpi eq, %1, %3 : vector<128x128xi32>
    %5 = arith.extui %4 : vector<128x128xi1> to vector<128x128xi32>
    %6 = arith.sitofp %5 : vector<128x128xi32> to vector<128x128xf32>
    %7 = arith.truncf %6 : vector<128x128xf32> to vector<128x128xbf16>
    %8 = vector.extract_strided_slice %0 {offsets = [0, 1], sizes = [128, 1], strides = [1, 1]} : vector<128x5xi32> to vector<128x1xi32>
    %9 = vector.broadcast %8 : vector<128x1xi32> to vector<128x128xi32>
    %10 = arith.cmpi eq, %1, %9 : vector<128x128xi32>
    %11 = arith.extui %10 : vector<128x128xi1> to vector<128x128xi32>
    %12 = arith.sitofp %11 : vector<128x128xi32> to vector<128x128xf32>
    %13 = arith.truncf %12 : vector<128x128xf32> to vector<128x128xbf16>
    %14 = vector.extract_strided_slice %0 {offsets = [0, 2], sizes = [128, 1], strides = [1, 1]} : vector<128x5xi32> to vector<128x1xi32>
    %15 = vector.broadcast %14 : vector<128x1xi32> to vector<128x128xi32>
    %16 = arith.cmpi eq, %1, %15 : vector<128x128xi32>
    %17 = arith.extui %16 : vector<128x128xi1> to vector<128x128xi32>
    %18 = arith.sitofp %17 : vector<128x128xi32> to vector<128x128xf32>
    %19 = arith.truncf %18 : vector<128x128xf32> to vector<128x128xbf16>
    %20 = vector.extract_strided_slice %0 {offsets = [0, 3], sizes = [128, 1], strides = [1, 1]} : vector<128x5xi32> to vector<128x1xi32>
    %21 = vector.broadcast %20 : vector<128x1xi32> to vector<128x128xi32>
    %22 = arith.cmpi eq, %1, %21 : vector<128x128xi32>
    %23 = arith.extui %22 : vector<128x128xi1> to vector<128x128xi32>
    %24 = arith.sitofp %23 : vector<128x128xi32> to vector<128x128xf32>
    %25 = arith.truncf %24 : vector<128x128xf32> to vector<128x128xbf16>
    %26 = vector.extract_strided_slice %0 {offsets = [0, 4], sizes = [128, 1], strides = [1, 1]} : vector<128x5xi32> to vector<128x1xi32>
    %27 = vector.broadcast %26 : vector<128x1xi32> to vector<128x128xi32>
    %28 = arith.cmpi eq, %1, %27 : vector<128x128xi32>
    %29 = arith.extui %28 : vector<128x128xi1> to vector<128x128xi32>
    %30 = arith.sitofp %29 : vector<128x128xi32> to vector<128x128xf32>
    %31 = arith.truncf %30 : vector<128x128xf32> to vector<128x128xbf16>
    %32 = tpu.concatenate %7, %13, %19, %25, %31 in 1 : vector<128x128xbf16>, vector<128x128xbf16>, vector<128x128xbf16>, vector<128x128xbf16>, vector<128x128xbf16> -> vector<128x640xbf16>
    %c0_1 = arith.constant 0 : index
    %c0_2 = arith.constant 0 : index
    %33 = vector.load %arg2[%c0_1, %c0_2] : memref<640x384xbf16, #tpu.memory_space<vmem>>, vector<640x384xbf16>
    %cst = arith.constant dense<0.000000e+00> : vector<128x384xf32>
    %34 = tpu.matmul %32, %33, %cst {dimension_numbers = #tpu.dot_dimension_numbers<[1], [0], [0], [1], [0, 0, 1, 1], [], []>} : vector<128x640xbf16>, vector<640x384xbf16>, vector<128x384xf32> -> vector<128x384xf32>
    %c0_3 = arith.constant 0 : index
    %c0_4 = arith.constant 0 : index
    %35 = vector.load %arg3[%c0_3, %c0_4] : memref<1x384xf32, #tpu.memory_space<vmem>>, vector<1x384xf32>
    %36 = vector.broadcast %35 : vector<1x384xf32> to vector<128x384xf32>
    %37 = arith.addf %34, %36 : vector<128x384xf32>
    %cst_5 = arith.constant 0.000000e+00 : f32
    %38 = vector.broadcast %cst_5 : f32 to vector<128x384xf32>
    %39 = arith.maximumf %37, %38 : vector<128x384xf32>
    %40 = vector.shape_cast %39 : vector<128x384xf32> to vector<8x16x384xf32>
    %c0_6 = arith.constant 0 : index
    %c0_7 = arith.constant 0 : index
    %41 = vector.load %arg4[%c0_6, %c0_7] : memref<16x384xf32, #tpu.memory_space<vmem>>, vector<16x384xf32>
    %42 = vector.shape_cast %41 : vector<16x384xf32> to vector<1x16x384xf32>
    %43 = vector.broadcast %42 : vector<1x16x384xf32> to vector<8x16x384xf32>
    %44 = arith.mulf %40, %43 : vector<8x16x384xf32>
    %cst_8 = arith.constant dense<0xFF800000> : vector<8x384xf32>
    %45 = vector.multi_reduction <maximumf>, %44, %cst_8 [1] : vector<8x16x384xf32> to vector<8x384xf32>
    %46 = arith.truncf %45 : vector<8x384xf32> to vector<8x384xbf16>
    %c0_9 = arith.constant 0 : index
    %c0_10 = arith.constant 0 : index
    %47 = vector.load %arg5[%c0_9, %c0_10] : memref<384x128xbf16, #tpu.memory_space<vmem>>, vector<384x128xbf16>
    %cst_11 = arith.constant dense<0.000000e+00> : vector<8x128xf32>
    %48 = tpu.matmul %46, %47, %cst_11 {dimension_numbers = #tpu.dot_dimension_numbers<[1], [0], [0], [1], [0, 0, 1, 1], [], []>} : vector<8x384xbf16>, vector<384x128xbf16>, vector<8x128xf32> -> vector<8x128xf32>
    %c0_12 = arith.constant 0 : index
    %c0_13 = arith.constant 0 : index
    %49 = vector.load %arg6[%c0_12, %c0_13] : memref<1x128xf32, #tpu.memory_space<vmem>>, vector<1x128xf32>
    %50 = vector.broadcast %49 : vector<1x128xf32> to vector<8x128xf32>
    %51 = arith.addf %48, %50 : vector<8x128xf32>
    %c0_14 = arith.constant 0 : index
    %c0_15 = arith.constant 0 : index
    %52 = vector.load %arg7[%c0_14, %c0_15] : memref<8x128xf32, #tpu.memory_space<vmem>>, vector<8x128xf32>
    tpu.vector_store %arg7[%c0_14, %c0_15], %51 {strides = array<i32>} : memref<8x128xf32, #tpu.memory_space<vmem>>, vector<8x128xf32>,
    return
  }
  func.func @transform_0(%arg0: i32) -> (i32, i32) {
    %c0_i32 = arith.constant 0 : i32
    %c0_i32_0 = arith.constant 0 : i32
    return %arg0, %c0_i32 : i32, i32
  }
  func.func @transform_1(%arg0: i32) -> (i32, i32) {
    %c0_i32 = arith.constant 0 : i32
    %c0_i32_0 = arith.constant 0 : i32
    %c0_i32_1 = arith.constant 0 : i32
    return %c0_i32, %c0_i32_0 : i32, i32
  }
  func.func @transform_2(%arg0: i32) -> (i32, i32) {
    %c0_i32 = arith.constant 0 : i32
    %c0_i32_0 = arith.constant 0 : i32
    %c0_i32_1 = arith.constant 0 : i32
    return %c0_i32, %c0_i32_0 : i32, i32
  }
  func.func @transform_3(%arg0: i32) -> (i32, i32) {
    %c0_i32 = arith.constant 0 : i32
    %c0_i32_0 = arith.constant 0 : i32
    %c0_i32_1 = arith.constant 0 : i32
    return %c0_i32, %c0_i32_0 : i32, i32
  }
  func.func @transform_4(%arg0: i32) -> (i32, i32) {
    %c0_i32 = arith.constant 0 : i32
    %c0_i32_0 = arith.constant 0 : i32
    %c0_i32_1 = arith.constant 0 : i32
    return %c0_i32, %c0_i32_0 : i32, i32
  }
  func.func @transform_5(%arg0: i32) -> (i32, i32) {
    %c0_i32 = arith.constant 0 : i32
    %c0_i32_0 = arith.constant 0 : i32
    %c0_i32_1 = arith.constant 0 : i32
    return %c0_i32, %c0_i32_0 : i32, i32
  }
  func.func @transform_6(%arg0: i32) -> (i32, i32) {
    %c0_i32 = arith.constant 0 : i32
    %c0_i32_0 = arith.constant 0 : i32
    return %arg0, %c0_i32 : i32, i32
  }
}

</mosaic_0001>

<bundles_post_ra>
// kernel: tpu_custom_call.1
= control target key start
LH: loop header
LB: loop body
LE: loop exit
PB: predicated region body
PF: predicated region fallthrough
CT: control target
= control target key end

     0   :  { %11 = vsyncpa [#allocation3], 0  ;;  %s4892_s0 = inlined_call_operand.vmem [shape: s32[128,5], index: 0, kind: input, shape index: {}]   ;;  %s4893_s1 = inlined_call_operand.hbm [shape: bf16[640,384], index: 1, kind: input, shape index: {}]   ;;  %s4894_s2 = inlined_call_operand.vmem [shape: f32[1,384], index: 2, kind: input, shape index: {}]   ;;  %s4895_s3 = inlined_call_operand.vmem [shape: f32[16,384], index: 3, kind: input, shape index: {}]   ;;  %s4896_s4 = inlined_call_operand.hbm [shape: bf16[384,128], index: 4, kind: input, shape index: {}]   ;;  %s4897_s5 = inlined_call_operand.vmem [shape: f32[1,128], index: 5, kind: input, shape index: {}]   ;;  %s4898_s6 = inlined_call_operand.hbm [shape: f32[8,128], index: 6, kind: output, shape index: {}]  }
   0x1   :  { %12 = vsyncpa [#allocation6], 0 }
   0x2   :  { %13 = vsyncpa [#allocation4], 0  ;;  %s3638_s21 = smov [#allocation2]  }
   0x3   :  { %s21_s22 = sshll.u32 %s3638_s21, 4  ;;  %s22_s22 = int_to_ptr.vmem [resolvable:$true] %s21_s22 }
   0x4   :  { %s3580_s23 = scalar_lea.vmem %s22_s22, 15360  ;;  %p3585_p1 = scmp.lt.s32.totalorder %s22_s22, %s22_s22 }
   0x5   :  { %p3581_p0 = scmp.ne.s32.totalorder %s22_s22, %s3580_s23  ;;  %p3586_p2 = scmp.lt.s32.totalorder %s3580_s23, %s3580_s23 }
   0x7   :  { %p3587_p3 = por %p3586_p2, %p3585_p1 }
   0x9   :  { %p3588_p4 = pnand %p3587_p3, %p3581_p0 }
   0xb   :  { %3591 = shalt.err (!%p3588_p4)
}
   0xc   :  { %s3639_s24 = smov 192   ;;  %s3640_s25 = smov 12  }
   0xd   :  { %27 = dma.hbm_to_vmem [thread:$0]  %s4893_s1, 15360, %s22_s22, [#allocation3], %s3639_s24, %s3639_s24, %s3640_s25  }
   0xe   :  { %s3641_s28 = smov [#allocation5]  }
   0xf   :  { %s37_s29 = sshll.u32 %s3641_s28, 4  ;;  %s38_s29 = int_to_ptr.vmem [resolvable:$true] %s37_s29 }
  0x10   :  { %s3600_s30 = scalar_lea.vmem %s38_s29, 3072  ;;  %p3605_p6 = scmp.lt.s32.totalorder %s38_s29, %s38_s29 }
  0x11   :  { %p3601_p5 = scmp.ne.s32.totalorder %s38_s29, %s3600_s30  ;;  %p3606_p7 = scmp.lt.s32.totalorder %s3600_s30, %s3600_s30 }
  0x13   :  { %p3607_p8 = por %p3606_p7, %p3605_p6 }
  0x15   :  { %p3608_p9 = pnand %p3607_p8, %p3601_p5 }
  0x17   :  { %3611 = shalt.err (!%p3608_p9)
}
  0x18   :  { %s3642_s7 = smov 64   ;;  %s3643_s8 = smov 4  }
  0x19   :  { %43 = dma.hbm_to_vmem [thread:$0]  %s4896_s4, 3072, %s38_s29, [#allocation6], %s3642_s7, %s3642_s7, %s3643_s8  }
  0x1a   :  { %3632 = dma.done.wait [#allocation3], 15360  }
  0x1b   :  { %3633 = vsyncadd [#allocation3], 4294951936 }
  0x1c   :  { %3634 = dma.done.wait [#allocation6], 3072  }
  0x1d   :  { %3635 = vsyncadd [#allocation6], 4294964224  ;;  %v3644_v0 = vmov 1   ;;  %v3645_v1 = vmov 0   ;;  %v3699_v2 = vld [vmem:[%s4892_s0] sm:$0xff]  ;;  %v3706_v3 = vld [vmem:[%s4892_s0 + $0x8] sm:$0xff] }
  0x1e   :  { %3337 = vset.pattern.permute.xlu0 %v3644_v0  ;;  %3338 = vset.pattern.permute.xlu1 %v3645_v1  ;;  %v3383_v4 = vld [vmem:[#allocation2 + $0xac] ss:$12 sps:$4 sm:$0xff]   ;;  %v3385_v5 = vld [vmem:[#allocation2 + $0xa8] ss:$12 sps:$4 sm:$0xff]   ;;  %v3388_v9 = vld [vmem:[#allocation2 + $0x90] ss:$12 sps:$4 sm:$0xff]  }
  0x1f   :  { %72 = vperm.xlu1 %3338, %v3699_v2   ;;  %176 = vperm.xlu0 %3337, %v3699_v2   ;;  %v3713_v6 = vld [vmem:[%s4892_s0 + $0x10] sm:$0xff]  ;;  %v3718_v7 = vld [vmem:[%s4892_s0 + $0x18] sm:$0xff]  ;;  %v3646_v13 = vmov 3   ;;  %v3730_v14 = vld [vmem:[%s4892_s0 + $0x20] sm:$0xff]  ;;  %v3647_v36 = vmov 2   ;;  %s3652_s12 = smov [#allocation7]  }
  0x20   :  { %1408 = vmatprep.subr.bf16.mxu0 %v3383_v4  ;;  %v3386_v8 = vld [vmem:[#allocation2 + $0x94] ss:$12 sps:$4 sm:$0xff]   ;;  %v3389_v10 = vld [vmem:[#allocation2 + $0x7c] ss:$12 sps:$4 sm:$0xff]   ;;  %v3391_v11 = vld [vmem:[#allocation2 + $0x78] ss:$12 sps:$4 sm:$0xff]  }
  0x21   :  { %1409 = vmatpush1.bf16.msra.mxu0 %v3385_v5  ;;  %v3392_v12 = vld [vmem:[#allocation2 + $0x64] ss:$12 sps:$4 sm:$0xff]   ;;  %v3394_v15 = vld [vmem:[#allocation2 + $0x60] ss:$12 sps:$4 sm:$0xff]   ;;  %v3397_v18 = vld [vmem:[#allocation2 + $0x48] ss:$12 sps:$4 sm:$0xff]  }
  0x22   :  { %1410 = vmatprep.subr.bf16.mxu0 %v3386_v8  ;;  %v3395_v16 = vld [vmem:[#allocation2 + $0x4c] ss:$12 sps:$4 sm:$0xff]   ;;  %v3739_v17 = vld [vmem:[%s4892_s0 + $0x30] sm:$0xff]  ;;  %v3401_v23 = vld [vmem:[#allocation2 + $0x1c] ss:$12 sps:$4 sm:$0xff]   ;;  %s2700_s13 = sshll.u32 %s3652_s12, 4  ;;  %s2701_s13 = int_to_ptr.vmem [resolvable:$true] %s2700_s13 }
  0x23   :  { %75 = vperm.xlu1 %3338, %v3706_v3   ;;  %179 = vperm.xlu0 %3337, %v3706_v3   ;;  %v3398_v19 = vld [vmem:[#allocation2 + $0x34] ss:$12 sps:$4 sm:$0xff]   ;;  %v3751_v21 = vld [vmem:[%s4892_s0 + $0x28] sm:$0xff]  ;;  %v3400_v22 = vld [vmem:[#allocation2 + $0x30] ss:$12 sps:$4 sm:$0xff]   ;;  %s3612_s14 = scalar_lea.vmem %s2701_s13, 128  ;;  %p3617_p11 = scmp.lt.s32.totalorder %s2701_s13, %s2701_s13 }
  0x24   :  { %v3745_v20 = vld [vmem:[%s4892_s0 + $0x50] sm:$0xff]  ;;  %v3428_v24 = vld [vmem:[#allocation2 + $0x22c] ss:$12 sps:$4 sm:$0xff]   ;;  %v3437_v32 = vld [vmem:[#allocation2 + $0x1fc] ss:$12 sps:$4 sm:$0xff]   ;;  %p3613_p10 = scmp.ne.s32.totalorder %s2701_s13, %s3612_s14  ;;  %p3618_p12 = scmp.lt.s32.totalorder %s3612_s14, %s3612_s14 }
  0x25   :  { %1411 = vmatpush1.bf16.msra.mxu0 %v3388_v9  ;;  %v3430_v25 = vld [vmem:[#allocation2 + $0x228] ss:$12 sps:$4 sm:$0xff]   ;;  %v3403_v27 = vld [vmem:[#allocation2 + $0x18] ss:$12 sps:$4 sm:$0xff]   ;;  %1521 = vmatprep.subr.bf16.mxu1 %v3428_v24  ;;  %v3436_v30 = vld [vmem:[#allocation2 + $0x210] ss:$12 sps:$4 sm:$0xff]  }
  0x26   :  { %1412 = vmatprep.subr.bf16.mxu0 %v3389_v10  ;;  %v3758_v26 = vld [vmem:[%s4892_s0 + $0x68] sm:$0xff]  ;;  %v3434_v28 = vld [vmem:[#allocation2 + $0x214] ss:$12 sps:$4 sm:$0xff]   ;;  %v3404_v29 = vld [vmem:[#allocation2 + $0x4] ss:$12 sps:$4 sm:$0xff]   ;;  %1522 = vmatpush1.bf16.msra.mxu1 %v3430_v25  ;;  %p3619_p13 = por %p3618_p12, %p3617_p11 }
  0x27   :  { %3339 = vset.pattern.permute.xlu1 %v3644_v0  ;;  %182 = vperm.xlu0 %3337, %v3713_v6   ;;  %v3765_v31 = vld [vmem:[%s4892_s0 + $0x38] sm:$0xff]  ;;  %v3406_v33 = vld [vmem:[#allocation2] ss:$12 sps:$4 sm:$0xff]   ;;  %v3440_v37 = vld [vmem:[#allocation2 + $0x1e4] ss:$12 sps:$4 sm:$0xff]  }
  0x28   :  { %185 = vperm.xlu1 %3339, %v3718_v7   ;;  %1523 = vmatprep.subr.bf16.mxu1 %v3434_v28  ;;  %v3407_v34 = vld [vmem:[#allocation2 + $0x16c] ss:$12 sps:$4 sm:$0xff]   ;;  %v3409_v38 = vld [vmem:[#allocation2 + $0x168] ss:$12 sps:$4 sm:$0xff]   ;;  %v3776_v41 = vld [vmem:[%s4892_s0 + $0x40] sm:$0xff]  ;;  %p3620_p0 = pnand %p3619_p13, %p3613_p10 }
  0x29   :  { %1413 = vmatpush1.bf16.msra.mxu0 %v3391_v11  ;;  %v3439_v35 = vld [vmem:[#allocation2 + $0x1f8] ss:$12 sps:$4 sm:$0xff]   ;;  %v3410_v39 = vld [vmem:[#allocation2 + $0x154] ss:$12 sps:$4 sm:$0xff]   ;;  %v3412_v43 = vld [vmem:[#allocation2 + $0x150] ss:$12 sps:$4 sm:$0xff]  }
  0x2a   :  { %1414 = vmatprep.subr.bf16.mxu0 %v3392_v12  ;;  %1524 = vmatpush1.bf16.msra.mxu1 %v3436_v30  ;;  %v3442_v40 = vld [vmem:[#allocation2 + $0x1e0] ss:$12 sps:$4 sm:$0xff]   ;;  %v3413_v44 = vld [vmem:[#allocation2 + $0x13c] ss:$12 sps:$4 sm:$0xff]   ;;  %v3415_v47 = vld [vmem:[#allocation2 + $0x138] ss:$12 sps:$4 sm:$0xff]  }
  0x2b   :  { %3347 = vset.pattern.permute.xlu0 %v3646_v13  ;;  %1525 = vmatprep.subr.bf16.mxu1 %v3437_v32  ;;  %v3443_v42 = vld [vmem:[#allocation2 + $0x1cc] ss:$12 sps:$4 sm:$0xff]   ;;  %v3445_v45 = vld [vmem:[#allocation2 + $0x1c8] ss:$12 sps:$4 sm:$0xff]   ;;  %v3448_v48 = vld [vmem:[#allocation2 + $0x1b0] ss:$12 sps:$4 sm:$0xff]  }
  0x2c   :  { %3340 = vset.pattern.permute.xlu1 %v3645_v1  ;;  %384 = vperm.xlu0 %3347, %v3699_v2   ;;  %v3446_v46 = vld [vmem:[#allocation2 + $0x1b4] ss:$12 sps:$4 sm:$0xff]   ;;  %v3416_v49 = vld [vmem:[#allocation2 + $0x124] ss:$12 sps:$4 sm:$0xff]   ;;  %v3449_v50 = vld [vmem:[#allocation2 + $0x19c] ss:$12 sps:$4 sm:$0xff]  }
  0x2d   :  { %81 = vperm.xlu1 %3340, %v3718_v7   ;;  %1415 = vmatpush1.bf16.msra.mxu0 %v3394_v15  ;;  %v3787_v51 = vld [vmem:[%s4892_s0 + $0x48] sm:$0xff]  ;;  %v3451_v53 = vld [vmem:[#allocation2 + $0x198] ss:$12 sps:$4 sm:$0xff]   ;;  %v3422_v58 = vld [vmem:[#allocation2 + $0xf4] ss:$12 sps:$4 sm:$0xff]  }
  0x2e   :  { %1416 = vmatprep.subr.bf16.mxu0 %v3395_v16  ;;  %1526 = vmatpush1.bf16.msra.mxu1 %v3439_v35  ;;  %v3418_v52 = vld [vmem:[#allocation2 + $0x120] ss:$12 sps:$4 sm:$0xff]   ;;  %v3452_v55 = vld [vmem:[#allocation2 + $0x184] ss:$12 sps:$4 sm:$0xff]   ;;  %v3421_v57 = vld [vmem:[#allocation2 + $0x108] ss:$12 sps:$4 sm:$0xff]  }
  0x2f   :  { %1527 = vmatprep.subr.bf16.mxu1 %v3440_v37  ;;  %v3419_v54 = vld [vmem:[#allocation2 + $0x10c] ss:$12 sps:$4 sm:$0xff]   ;;  %v3794_v56 = vld [vmem:[%s4892_s0 + $0x60] sm:$0xff]  ;;  %v3424_v61 = vld [vmem:[#allocation2 + $0xf0] ss:$12 sps:$4 sm:$0xff]  }
  0x30   :  { %3348 = vset.pattern.permute.xlu0 %v3645_v1  ;;  %v3454_v59 = vld [vmem:[#allocation2 + $0x180] ss:$12 sps:$4 sm:$0xff]   ;;  %v3801_v60 = vld [vmem:[%s4892_s0 + $0x78] sm:$0xff]  ;;  %v3457_v4 = vld [vmem:[#allocation2 + $0x2e8] ss:$12 sps:$4 sm:$0xff]  }
  0x31   :  { %3341 = vset.pattern.permute.xlu1 %v3644_v0  ;;  %78 = vperm.xlu0 %3348, %v3713_v6   ;;  %v3455_v62 = vld [vmem:[#allocation2 + $0x2ec] ss:$12 sps:$4 sm:$0xff]   ;;  %v3425_v63 = vld [vmem:[#allocation2 + $0xdc] ss:$12 sps:$4 sm:$0xff]   ;;  %v3458_v5 = vld [vmem:[#allocation2 + $0x2d4] ss:$12 sps:$4 sm:$0xff]  }
  0x32   :  { %188 = vperm.xlu1 %3341, %v3730_v14   ;;  %1417 = vmatpush1.bf16.msra.mxu0 %v3397_v18  ;;  %v3427_v8 = vld [vmem:[#allocation2 + $0xd8] ss:$12 sps:$4 sm:$0xff]   ;;  %v3460_v10 = vld [vmem:[#allocation2 + $0x2d0] ss:$12 sps:$4 sm:$0xff]   ;;  %v3433_v12 = vld [vmem:[#allocation2 + $0xc0] ss:$12 sps:$4 sm:$0xff]  }
  0x33   :  { %1418 = vmatprep.subr.bf16.mxu0 %v3398_v19  ;;  %1528 = vmatpush1.bf16.msra.mxu1 %v3442_v40  ;;  %v3431_v9 = vld [vmem:[#allocation2 + $0xc4] ss:$12 sps:$4 sm:$0xff]   ;;  %v3461_v11 = vld [vmem:[#allocation2 + $0x2bc] ss:$12 sps:$4 sm:$0xff]   ;;  %v3466_v19 = vld [vmem:[#allocation2 + $0x2a0] ss:$12 sps:$4 sm:$0xff]  }
  0x34   :  { %1529 = vmatprep.subr.bf16.mxu1 %v3443_v42  ;;  %v3463_v15 = vld [vmem:[#allocation2 + $0x2b8] ss:$12 sps:$4 sm:$0xff]   ;;  %v3470_v24 = vld [vmem:[#allocation2 + $0x274] ss:$12 sps:$4 sm:$0xff]   ;;  %v3472_v25 = vld [vmem:[#allocation2 + $0x270] ss:$12 sps:$4 sm:$0xff]  }
  0x35   :  { %90 = vperm.xlu0 %3348, %v3739_v17   ;;  %v3815_v16 = vld [vmem:[%s4892_s0 + $0x58] sm:$0xff]  ;;  %v3464_v18 = vld [vmem:[#allocation2 + $0x2a4] ss:$12 sps:$4 sm:$0xff]   ;;  %v3478_v30 = vld [vmem:[#allocation2 + $0x240] ss:$12 sps:$4 sm:$0xff]  }
  0x36   :  { %3342 = vset.pattern.permute.xlu1 %v3645_v1  ;;  %1419 = vmatpush1.bf16.msra.mxu0 %v3400_v22  ;;  %v3467_v22 = vld [vmem:[#allocation2 + $0x28c] ss:$12 sps:$4 sm:$0xff]   ;;  %v3484_v42 = vld [vmem:[#allocation2 + $0x394] ss:$12 sps:$4 sm:$0xff]  }
  0x37   :  { %84 = vperm.xlu1 %3342, %v3730_v14   ;;  %1420 = vmatprep.subr.bf16.mxu0 %v3401_v23  ;;  %v3469_v23 = vld [vmem:[#allocation2 + $0x288] ss:$12 sps:$4 sm:$0xff]   ;;  %v3475_v28 = vld [vmem:[#allocation2 + $0x258] ss:$12 sps:$4 sm:$0xff]  }
  0x38   :  { %1530 = vmatpush1.bf16.msra.mxu1 %v3445_v45  ;;  %v3481_v32 = vld [vmem:[#allocation2 + $0x3ac] ss:$12 sps:$4 sm:$0xff]  }
  0x39   :  { %102 = vperm.xlu0 %3348, %v3745_v20   ;;  %1531 = vmatprep.subr.bf16.mxu1 %v3446_v46  ;;  %v3482_v46 = vld [vmem:[#allocation2 + $0x390] ss:$12 sps:$4 sm:$0xff]  }
  0x3a   :  { %1421 = vmatpush1.bf16.msra.mxu0 %v3403_v27  ;;  %v3473_v27 = vld [vmem:[#allocation2 + $0x25c] ss:$12 sps:$4 sm:$0xff]  }
  0x3b   :  { %87 = vperm.xlu1 %3342, %v3751_v21   ;;  %1422 = vmatprep.subr.bf16.mxu0 %v3404_v29  ;;  %v3476_v29 = vld [vmem:[#allocation2 + $0x244] ss:$12 sps:$4 sm:$0xff]  }
  0x3c   :  { %1532 = vmatpush1.bf16.msra.mxu1 %v3448_v48  ;;  %v3487_v48 = vld [vmem:[#allocation2 + $0x37c] ss:$12 sps:$4 sm:$0xff]  }
  0x3d   :  { %111 = vperm.xlu0 %3348, %v3758_v26   ;;  %1533 = vmatprep.subr.bf16.mxu1 %v3449_v50 }
  0x3e   :  { %1423 = vmatpush1.bf16.msra.mxu0 %v3406_v33 }
  0x3f   :  { %3343 = vset.pattern.permute.xlu1 %v3644_v0  ;;  %1424 = vmatprep.subr.bf16.mxu0 %v3407_v34 }
  0x40   :  { %197 = vperm.xlu1 %3343, %v3765_v31   ;;  %1534 = vmatpush1.bf16.msra.mxu1 %v3451_v53  ;;  %v3490_v53 = vld [vmem:[#allocation2 + $0x364] ss:$12 sps:$4 sm:$0xff]  }
  0x41   :  { %3357 = vset.pattern.permute.xlu0 %v3647_v36  ;;  %1535 = vmatprep.subr.bf16.mxu1 %v3452_v55  ;;  %v3488_v55 = vld [vmem:[#allocation2 + $0x360] ss:$12 sps:$4 sm:$0xff]  }
  0x42   :  { %283 = vperm.xlu0 %3357, %v3706_v3   ;;  %1425 = vmatpush2.bf16.msra.mxu0 %v3409_v38 }
  0x43   :  { %1426 = vmatprep.subr.bf16.mxu0 %v3410_v39  ;;  %v3479_v39 = vld [vmem:[#allocation2 + $0x3a8] ss:$12 sps:$4 sm:$0xff]  }
  0x44   :  { %3344 = vset.pattern.permute.xlu1 %v3645_v1  ;;  %1536 = vmatpush1.bf16.msra.mxu1 %v3454_v59 }
  0x45   :  { %93 = vperm.xlu1 %3344, %v3765_v31   ;;  %1537 = vmatprep.subr.bf16.mxu1 %v3455_v62  ;;  %v3496_v62 = vld [vmem:[#allocation2 + $0x334] ss:$12 sps:$4 sm:$0xff]  }
  0x46   :  { %292 = vperm.xlu0 %3357, %v3730_v14   ;;  %1427 = vmatpush2.bf16.msra.mxu0 %v3412_v43  ;;  %v3649_v43 = vmov 1.0|1.0  }
  0x47   :  { %1428 = vmatprep.subr.bf16.mxu0 %v3413_v44 }
  0x48   :  { %1538 = vmatpush2.bf16.msra.mxu1 %v3457_v4 }
  0x49   :  { %3345 = vset.pattern.permute.xlu1 %v3644_v0  ;;  %1539 = vmatprep.subr.bf16.mxu1 %v3458_v5  ;;  %v3494_v5 = vld [vmem:[#allocation2 + $0x330] ss:$12 sps:$4 sm:$0xff]  }
  0x4a   :  { %200 = vperm.xlu1 %3345, %v3776_v41   ;;  %3359 = vset.pattern.permute.xlu0 %v3644_v0 }
  0x4b   :  { %191 = vperm.xlu0 %3359, %v3751_v21   ;;  %1429 = vmatpush2.bf16.msra.mxu0 %v3415_v47 }
  0x4c   :  { %1430 = vmatprep.subr.bf16.mxu0 %v3416_v49  ;;  %1540 = vmatpush2.bf16.msra.mxu1 %v3460_v10  ;;  %v3497_v10 = vld [vmem:[#allocation2 + $0x318] ss:$12 sps:$4 sm:$0xff]  }
  0x4d   :  { %1541 = vmatprep.subr.bf16.mxu1 %v3461_v11  ;;  %v3502_v11 = vld [vmem:[#allocation2 + $0x304] ss:$12 sps:$4 sm:$0xff]  }
  0x4e   :  { %3346 = vset.pattern.permute.xlu1 %v3645_v1 }
  0x4f   :  { %96 = vperm.xlu1 %3346, %v3776_v41   ;;  %194 = vperm.xlu0 %3359, %v3739_v17  }
  0x50   :  { %1431 = vmatpush2.bf16.msra.mxu0 %v3418_v52  ;;  %1542 = vmatpush2.bf16.msra.mxu1 %v3463_v15  ;;  %v3485_v52 = vld [vmem:[#allocation2 + $0x378] ss:$12 sps:$4 sm:$0xff]  }
  0x51   :  { %1432 = vmatprep.subr.bf16.mxu0 %v3419_v54  ;;  %1543 = vmatprep.subr.bf16.mxu1 %v3464_v18  ;;  %v3503_v18 = vld [vmem:[#allocation2 + $0x170] ss:$12 sps:$4 sm:$0xff]  }
  0x53   :  { %99 = vperm.xlu1 %3346, %v3787_v51   ;;  %203 = vperm.xlu0 %3359, %v3787_v51  }
  0x54   :  { %1433 = vmatpush2.bf16.msra.mxu0 %v3421_v57  ;;  %1544 = vmatpush2.bf16.msra.mxu1 %v3466_v19 }
  0x55   :  { %1434 = vmatprep.subr.bf16.mxu0 %v3422_v58  ;;  %1545 = vmatprep.subr.bf16.mxu1 %v3467_v22  ;;  %v3493_v58 = vld [vmem:[#allocation2 + $0x34c] ss:$12 sps:$4 sm:$0xff]   ;;  %v3567_v22 = vld [vmem:[%s4892_s0 + $0x10] sm:$0xff] }
  0x57   :  { %3349 = vset.pattern.permute.xlu1 %v3646_v13  ;;  %212 = vperm.xlu0 %3359, %v3794_v56  }
  0x58   :  { %387 = vperm.xlu1 %3349, %v3706_v3   ;;  %1435 = vmatpush2.bf16.msra.mxu0 %v3424_v61  ;;  %v3491_v61 = vld [vmem:[#allocation2 + $0x348] ss:$12 sps:$4 sm:$0xff]  }
  0x59   :  { %1436 = vmatprep.subr.bf16.mxu0 %v3425_v63  ;;  %1546 = vmatpush2.bf16.msra.mxu1 %v3469_v23 }
  0x5a   :  { %1547 = vmatprep.subr.bf16.mxu1 %v3470_v24  ;;  %v3568_v24 = vld [vmem:[%s4892_s0 + $0x18] sm:$0xff] }
  0x5b   :  { %221 = vperm.xlu0 %3359, %v3801_v60  }
  0x5c   :  { %3350 = vset.pattern.permute.xlu1 %v3647_v36  ;;  %1437 = vmatpush2.bf16.msra.mxu0 %v3427_v8  ;;  %v3499_v8 = vld [vmem:[#allocation2 + $0x31c] ss:$12 sps:$4 sm:$0xff]  }
  0x5d   :  { %280 = vperm.xlu1 %3350, %v3699_v2   ;;  %1438 = vmatprep.subr.bf16.mxu0 %v3431_v9 }
  0x5e   :  { %1548 = vmatpush2.bf16.msra.mxu1 %v3472_v25 }
  0x5f   :  { %3362 = vset.pattern.permute.xlu0 %v3646_v13  ;;  %1549 = vmatprep.subr.bf16.mxu1 %v3473_v27 }
  0x60   :  { %393 = vperm.xlu0 %3362, %v3718_v7   ;;  %1439 = vmatpush2.bf16.msra.mxu0 %v3433_v12  ;;  %v3500_v12 = vld [vmem:[#allocation2 + $0x300] ss:$12 sps:$4 sm:$0xff]  }
  0x61   :  { %3351 = vset.pattern.permute.xlu1 %v3644_v0  ;;  %1634 = vmatprep.subr.bf16.mxu0 %v3481_v32 }
  0x62   :  { %206 = vperm.xlu1 %3351, %v3745_v20   ;;  %1550 = vmatpush2.bf16.msra.mxu1 %v3475_v28 }
  0x63   :  { %1551 = vmatprep.subr.bf16.mxu1 %v3476_v29 }
  0x64   :  { %402 = vperm.xlu0 %3362, %v3739_v17  }
  0x66   :  { %209 = vperm.xlu1 %3351, %v3815_v16   ;;  %1552 = vmatpush2.bf16.msra.mxu1 %v3478_v30 }
  0x67   :  { %3095 = vmatprep.subr.bf16.mxu1 %v3503_v18  ;;  %v3521_v18 = vld [vmem:[#allocation2 + $0xe0] ss:$12 sps:$4 sm:$0xff]  }
  0x68   :  { %408 = vperm.xlu0 %3362, %v3776_v41  }
  0x6a   :  { %3352 = vset.pattern.permute.xlu1 %v3645_v1 }
  0x6b   :  { %105 = vperm.xlu1 %3352, %v3815_v16  }
  0x6c   :  { %414 = vperm.xlu0 %3362, %v3745_v20  }
  0x6f   :  { %3353 = vset.pattern.permute.xlu1 %v3646_v13 }
  0x70   :  { %390 = vperm.xlu1 %3353, %v3713_v6   ;;  %3370 = vset.pattern.permute.xlu0 %v3647_v36 }
  0x71   :  { %301 = vperm.xlu0 %3370, %v3765_v31  }
  0x74   :  { %3354 = vset.pattern.permute.xlu1 %v3647_v36 }
  0x75   :  { %286 = vperm.xlu1 %3354, %v3713_v6   ;;  %307 = vperm.xlu0 %3370, %v3787_v51   ;;  %v3843_v6 = vld [vmem:[%s4892_s0 + $0x70] sm:$0xff] }
  0x79   :  { %289 = vperm.xlu1 %3354, %v3718_v7   ;;  %313 = vperm.xlu0 %3370, %v3815_v16   ;;  %v3648_v7 = vmov 4  }
  0x7d   :  { %3355 = vset.pattern.permute.xlu1 %v3644_v0  ;;  %319 = vperm.xlu0 %3370, %v3758_v26  }
  0x7e   :  { %215 = vperm.xlu1 %3355, %v3758_v26  }
  0x81   :  { %3376 = vset.pattern.permute.xlu0 %v3646_v13 }
  0x82   :  { %3356 = vset.pattern.permute.xlu1 %v3645_v1  ;;  %420 = vperm.xlu0 %3376, %v3794_v56  }
  0x83   :  { %108 = vperm.xlu1 %3356, %v3794_v56  }
  0x86   :  { %426 = vperm.xlu0 %3376, %v3843_v6  }
  0x87   :  { %3358 = vset.pattern.permute.xlu1 %v3646_v13 }
  0x88   :  { %396 = vperm.xlu1 %3358, %v3730_v14   ;;  %v69_v14 = vlaneseq }
  0x8a   :  { %3380 = vset.pattern.permute.xlu0 %v3647_v36  ;;  %v3861_v35 = vand.u32 127, %v69_v14 }
  0x8b   :  { %325 = vperm.xlu0 %3380, %v3801_v60  }
  0x8c   :  { %399 = vperm.xlu1 %3358, %v3751_v21  }
  0x8f   :  { %3382 = vset.pattern.permute.xlu0 %v3648_v7 }
  0x90   :  { %3360 = vset.pattern.permute.xlu1 %v3647_v36  ;;  %518 = vperm.xlu0 %3382, %v3745_v20  }
  0x91   :  { %295 = vperm.xlu1 %3360, %v3751_v21  }
  0x94   :  { %527 = vperm.xlu0 %3382, %v3758_v26  }
  0x95   :  { %3361 = vset.pattern.permute.xlu1 %v3644_v0 }
  0x96   :  { %218 = vperm.xlu1 %3361, %v3843_v6  }
  0x98   :  { %533 = vperm.xlu0 %3382, %v3801_v60  }
  0x9a   :  { %3363 = vset.pattern.permute.xlu1 %v3645_v1  ;;  %v73_v33 = vpop.permute.xlu1 %72  ;;  %v177_v34 = vpop.permute.xlu0 %176 }
  0x9b   :  { %114 = vperm.xlu1 %3363, %v3843_v6   ;;  %vm223_vm0 = vcmp.eq.s32.totalorder %v3861_v35, %v177_v34  ;;  %vm119_vm1 = vcmp.eq.s32.totalorder %v3861_v35, %v73_v33  ;;  %v3542_v33 = vld [vmem:[#allocation2 + $0x308] ss:$12 sps:$4 sm:$0xff]  }
  0x9e   :  { %v76_v37 = vpop.permute.xlu1 %75  ;;  %v180_v38 = vpop.permute.xlu0 %179 }
  0x9f   :  { %vm120_vm2 = vcmp.eq.s32.totalorder %v3861_v35, %v76_v37  ;;  %vm224_vm3 = vcmp.eq.s32.totalorder %v3861_v35, %v180_v38  ;;  %117 = vperm.xlu1 %3363, %v3801_v60  }
  0xa0   :  { %vm3869_vm4 = vmpackc.low %vm120_vm2, %vm119_vm1 }
  0xa1   :  { %vm3873_vm5 = vmpackc.low %vm224_vm3, %vm223_vm0 }
  0xa2   :  { %2911 = vmatprep.mubr.msk.bf16.mxu0 %vm3873_vm5, %v3649_v43  ;;  %v183_v44 = vpop.permute.xlu0 %182 }
  0xa3   :  { %2913 = vmatmul.mubr.msk.bf16.vlgmr.msra.gmra.mxu0 %vm3869_vm4, %v3649_v43  ;;  %3364 = vset.pattern.permute.xlu1 %v3646_v13  ;;  %v186_v45 = vpop.permute.xlu1 %185  ;;  %vm225_vm6 = vcmp.eq.s32.totalorder %v3861_v35, %v183_v44 }
  0xa4   :  { %vm226_vm7 = vcmp.eq.s32.totalorder %v3861_v35, %v186_v45  ;;  %405 = vperm.xlu1 %3364, %v3765_v31   ;;  %1635 = vmatpush1.bf16.msra.mxu0 %v3479_v39 }
  0xa5   :  { %vm3887_vm8 = vmpackc.low %vm226_vm7, %vm225_vm6  ;;  %1636 = vmatprep.subr.bf16.mxu0 %v3484_v42  ;;  %v3569_v42 = vld [vmem:[%s4892_s0 + $0x20] sm:$0xff] }
  0xa6   :  { %2915 = vmatprep.mubr.msk.bf16.mxu0 %vm3887_vm8, %v3649_v43 }
  0xa7   :  { %v3894_v49 = vpop.permute.xlu0 %384 }
  0xa8   :  { %3365 = vset.pattern.permute.xlu1 %v3647_v36  ;;  %v82_v50 = vpop.permute.xlu1 %81  ;;  %1637 = vmatpush1.bf16.msra.mxu0 %v3482_v46  ;;  %v3504_v46 = vld [vmem:[#allocation2 + $0xb0] ss:$12 sps:$4 sm:$0xff]  }
  0xa9   :  { %298 = vperm.xlu1 %3365, %v3739_v17   ;;  %1638 = vmatprep.subr.bf16.mxu0 %v3487_v48  ;;  %vm122_vm9 = vcmp.eq.s32.totalorder %v3861_v35, %v82_v50  ;;  %v4944_v48 = vmov 0  ;;  %v4946_v50 = vmov 0 }
  0xac   :  { %v79_v54 = vpop.permute.xlu0 %78  ;;  %1639 = vmatpush1.bf16.msra.mxu0 %v3485_v52  ;;  %v3511_v52 = vld [vmem:[#allocation2 + $0x2f0] ss:$12 sps:$4 sm:$0xff]  }
  0xad   :  { %vm121_vm10 = vcmp.eq.s32.totalorder %v3861_v35, %v79_v54  ;;  %3366 = vset.pattern.permute.xlu1 %v3648_v7  ;;  %v189_v57 = vpop.permute.xlu1 %188  ;;  %1640 = vmatprep.subr.bf16.mxu0 %v3490_v53  ;;  %v3506_v53 = vld [vmem:[#allocation2 + $0x98] ss:$12 sps:$4 sm:$0xff]  }
  0xae   :  { %vm3901_vm11 = vmpackc.low %vm122_vm9, %vm121_vm10  ;;  %488 = vperm.xlu1 %3366, %v3699_v2   ;;  %vm227_vm13 = vcmp.eq.s32.totalorder %v3861_v35, %v189_v57  ;;  %v3508_v57 = vld [vmem:[#allocation2 + $0x80] ss:$12 sps:$4 sm:$0xff]  }
  0xaf   :  { %2917 = vmatmul.mubr.msk.bf16.gmra.mxu0 %vm3901_vm11, %v3649_v43 }
  0xb0   :  { %v91_v17 = vpop.permute.xlu0 %90  ;;  %1641 = vmatpush1.bf16.msra.mxu0 %v3488_v55  ;;  %v3507_v55 = vld [vmem:[#allocation2 + $0x140] ss:$12 sps:$4 sm:$0xff]  }
  0xb1   :  { %1642 = vmatprep.subr.bf16.mxu0 %v3493_v58  ;;  %vm125_vm7 = vcmp.eq.s32.totalorder %v3861_v35, %v91_v17 }
  0xb2   :  { %491 = vperm.xlu1 %3366, %v3706_v3   ;;  %v85_v63 = vpop.permute.xlu1 %84 }
  0xb3   :  { %vm123_vm15 = vcmp.eq.s32.totalorder %v3861_v35, %v85_v63  ;;  %v3513_v63 = vld [vmem:[#allocation2 + $0x110] ss:$12 sps:$4 sm:$0xff]  }
  0xb4   :  { %v3910_v4 = vpop.permute.xlu0 %102  ;;  %1643 = vmatpush1.bf16.msra.mxu0 %v3491_v61  ;;  %v3509_v61 = vld [vmem:[#allocation2 + $0x128] ss:$12 sps:$4 sm:$0xff]  }
  0xb5   :  { %1644 = vmatprep.subr.bf16.mxu0 %v3496_v62  ;;  %v3510_v62 = vld [vmem:[#allocation2 + $0x68] ss:$12 sps:$4 sm:$0xff]  }
  0xb6   :  { %3367 = vset.pattern.permute.xlu1 %v3646_v13  ;;  %v88_v2 = vpop.permute.xlu1 %87 }
  0xb7   :  { %411 = vperm.xlu1 %3367, %v3787_v51   ;;  %vm124_vm12 = vcmp.eq.s32.totalorder %v3861_v35, %v88_v2 }
  0xb8   :  { %v3914_v9 = vpop.permute.xlu0 %111  ;;  %1645 = vmatpush1.bf16.msra.mxu0 %v3494_v5  ;;  %vm3935_vm1 = vmpackc.low %vm124_vm12, %vm123_vm15 }
  0xb9   :  { %1646 = vmatprep.subr.bf16.mxu0 %v3499_v8  ;;  %v3570_v8 = vld [vmem:[%s4892_s0 + $0x30] sm:$0xff] }
  0xbb   :  { %3368 = vset.pattern.permute.xlu1 %v3647_v36  ;;  %v198_v3 = vpop.permute.xlu1 %197 }
  0xbc   :  { %304 = vperm.xlu1 %3368, %v3776_v41   ;;  %1647 = vmatpush1.bf16.msra.mxu0 %v3497_v10  ;;  %vm230_vm2 = vcmp.eq.s32.totalorder %v3861_v35, %v198_v3  ;;  %v4950_v10 = vmov 0 }
  0xbd   :  { %v284_v15 = vpop.permute.xlu0 %283  ;;  %1648 = vmatprep.subr.bf16.mxu0 %v3502_v11  ;;  %v3514_v11 = vld [vmem:[#allocation2 + $0x50] ss:$12 sps:$4 sm:$0xff]  }
  0xc0   :  { %3369 = vset.pattern.permute.xlu1 %v3648_v7  ;;  %v94_v19 = vpop.permute.xlu1 %93  ;;  %1649 = vmatpush1.bf16.msra.mxu0 %v3500_v12  ;;  %v3518_v12 = vld [vmem:[#allocation2 + $0x38] ss:$12 sps:$4 sm:$0xff]  }
  0xc1   :  { %494 = vperm.xlu1 %3369, %v3567_v22   ;;  %v3922_v23 = vpop.permute.xlu0 %292  ;;  %vm126_vm9 = vcmp.eq.s32.totalorder %v3861_v35, %v94_v19  ;;  %3159 = vmatprep.subr.bf16.mxu0 %v3511_v52  ;;  %v3522_v19 = vld [vmem:[#allocation2 + $0x20] ss:$12 sps:$4 sm:$0xff]  }
  0xc2   :  { %vm3961_vm12 = vmpackc.low %vm126_vm9, %vm125_vm7  ;;  %vm328_vm9 = vcmp.eq.s32.totalorder %v3861_v35, %v284_v15  ;;  %v4952_v15 = vmov 0 }
  0xc5   :  { %497 = vperm.xlu1 %3369, %v3568_v24   ;;  %v201_v25 = vpop.permute.xlu1 %200  ;;  %v4954_v24 = vmov 0 }
  0xc6   :  { %v192_v27 = vpop.permute.xlu0 %191 }
  0xc7   :  { %vm228_vm14 = vcmp.eq.s32.totalorder %v3861_v35, %v192_v27  ;;  %v4079_v27 = vld [vmem:[#allocation2 + $0x3b0] ss:$12 sps:$4 sm:$0xff]  }
  0xc8   :  { %vm3931_vm0 = vmpackc.low %vm228_vm14, %vm227_vm13  ;;  %vm231_vm13 = vcmp.eq.s32.totalorder %v3861_v35, %v201_v25  ;;  %vm431_vm14 = vcmp.eq.s32.totalorder %v3861_v35, %v3894_v49  ;;  %v3505_v49 = vld [vmem:[#allocation2 + $0x158] ss:$12 sps:$4 sm:$0xff]   ;;  %v4956_v25 = vmov 0 }
  0xc9   :  { %3371 = vset.pattern.permute.xlu1 %v3646_v13  ;;  %2919 = vmatprep.mubr.msk.bf16.mxu0 %vm3931_vm0, %v3649_v43 }
  0xca   :  { %417 = vperm.xlu1 %3371, %v3815_v16   ;;  %v97_v30 = vpop.permute.xlu1 %96  ;;  %2921 = vmatmul.mubr.msk.bf16.gmra.mxu0 %vm3935_vm1, %v3649_v43  ;;  %v195_v32 = vpop.permute.xlu0 %194 }
  0xcb   :  { %vm229_vm3 = vcmp.eq.s32.totalorder %v3861_v35, %v195_v32 }
  0xcc   :  { %vm3949_vm6 = vmpackc.low %vm230_vm2, %vm229_vm3 }
  0xcd   :  { %2923 = vmatprep.mubr.msk.bf16.mxu0 %vm3949_vm6, %v3649_v43 }
  0xce   :  { %3372 = vset.pattern.permute.xlu1 %v3647_v36  ;;  %v100_v34 = vpop.permute.xlu1 %99  ;;  %v204_v37 = vpop.permute.xlu0 %203 }
  0xcf   :  { %vm232_vm10 = vcmp.eq.s32.totalorder %v3861_v35, %v204_v37  ;;  %310 = vperm.xlu1 %3372, %v3745_v20   ;;  %vm128_vm7 = vcmp.eq.s32.totalorder %v3861_v35, %v100_v34 }
  0xd0   :  { %vm3968_vm15 = vmpackc.low %vm232_vm10, %vm231_vm13  ;;  %vm127_vm10 = vcmp.eq.s32.totalorder %v3861_v35, %v97_v30  ;;  %v4960_v30 = vmov 0 }
  0xd1   :  { %vm3994_vm13 = vmpackc.low %vm128_vm7, %vm127_vm10 }
  0xd2   :  { %2925 = vmatmul.mubr.msk.bf16.gmra.mxu0 %vm3961_vm12, %v3649_v43  ;;  %v4945_v48 = vsel %vm3994_vm13, 4294967295, %v4944_v48 }
  0xd3   :  { %3373 = vset.pattern.permute.xlu1 %v3648_v7  ;;  %v388_v20 = vpop.permute.xlu1 %387  ;;  %2927 = vmatprep.mubr.msk.bf16.mxu0 %vm3968_vm15, %v3649_v43 }
  0xd4   :  { %vm432_vm2 = vcmp.eq.s32.totalorder %v3861_v35, %v388_v20  ;;  %500 = vperm.xlu1 %3373, %v3569_v42  }
  0xd5   :  { %vm3983_vm3 = vmpackc.low %vm432_vm2, %vm431_vm14 }
  0xd6   :  { %2943 = vmatprep.mubr.msk.bf16.mxu1 %vm3983_vm3, %v3649_v43 }
  0xd8   :  { %503 = vperm.xlu1 %3373, %v3751_v21   ;;  %v281_v45 = vpop.permute.xlu1 %280  ;;  %v4009_v21 = vpop.permute.xlu0 %212 }
  0xd9   :  { %vm327_vm14 = vcmp.eq.s32.totalorder %v3861_v35, %v281_v45  ;;  %v4966_v45 = vmov 0 }
  0xda   :  { %vm3999_vm2 = vmpackc.low %vm328_vm9, %vm327_vm14  ;;  %2929 = vmatmul.mubr.msk.bf16.gmra.mxu0 %vm3994_vm13, %v3649_v43  ;;  %vm129_vm14 = vcmp.eq.s32.totalorder %v3861_v35, %v3910_v4  ;;  %v3517_v4 = vld [vmem:[#allocation2 + $0xf8] ss:$12 sps:$4 sm:$0xff]  }
  0xdb   :  { %v4947_v50 = vsel %vm3999_vm2, 4294967295, %v4946_v50  ;;  %2945 = vmatmul.mubr.msk.bf16.vlgmr.msra.gmra.mxu1 %vm3999_vm2, %v3649_v43 }
  0xdc   :  { %3374 = vset.pattern.permute.xlu1 %v3646_v13  ;;  %3096 = vmatpush3.bf16.msra.mxu1 %v3504_v46  ;;  %v4014_v17 = vpop.permute.xlu0 %221 }
  0xdd   :  { %423 = vperm.xlu1 %3374, %v3758_v26   ;;  %v207_v54 = vpop.permute.xlu1 %206  ;;  %3097 = vmatprep.subr.bf16.mxu1 %v3505_v49  ;;  %v4948_v26 = vmov 0 }
  0xde   :  { %vm233_vm7 = vcmp.eq.s32.totalorder %v3861_v35, %v207_v54 }
  0xe0   :  { %3098 = vmatpush3.bf16.msra.mxu1 %v3506_v53  ;;  %v394_v2 = vpop.permute.xlu0 %393  ;;  %v4970_v53 = vmov 0 }
  0xe1   :  { %3375 = vset.pattern.permute.xlu1 %v3647_v36  ;;  %v210_v58 = vpop.permute.xlu1 %209  ;;  %3099 = vmatprep.subr.bf16.mxu1 %v3507_v55 }
  0xe2   :  { %vm234_vm9 = vcmp.eq.s32.totalorder %v3861_v35, %v210_v58  ;;  %316 = vperm.xlu1 %3375, %v3794_v56   ;;  %v3515_v58 = vld [vmem:[#allocation2 + $0x2d8] ss:$12 sps:$4 sm:$0xff]  }
  0xe3   :  { %vm4019_vm10 = vmpackc.low %vm234_vm9, %vm233_vm7  ;;  %vm434_vm9 = vcmp.eq.s32.totalorder %v3861_v35, %v394_v2  ;;  %v3520_v2 = vld [vmem:[#allocation2 + $0x200] ss:$12 sps:$4 sm:$0xff]  }
  0xe4   :  { %v4949_v26 = vsel %vm4019_vm10, 4294967295, %v4948_v26  ;;  %2931 = vmatprep.mubr.msk.bf16.mxu0 %vm4019_vm10, %v3649_v43  ;;  %3100 = vmatpush3.bf16.msra.mxu1 %v3508_v57  ;;  %v403_v32 = vpop.permute.xlu0 %402  ;;  %v3512_v57 = vld [vmem:[#allocation2 + $0x230] ss:$12 sps:$4 sm:$0xff]  }
  0xe5   :  { %3101 = vmatprep.subr.bf16.mxu1 %v3509_v61  ;;  %v3516_v61 = vld [vmem:[#allocation2 + $0x218] ss:$12 sps:$4 sm:$0xff]  }
  0xe6   :  { %3377 = vset.pattern.permute.xlu1 %v3648_v7  ;;  %v106_v5 = vpop.permute.xlu1 %105 }
  0xe7   :  { %vm130_vm2 = vcmp.eq.s32.totalorder %v3861_v35, %v106_v5  ;;  %506 = vperm.xlu1 %3377, %v3570_v8   ;;  %v4974_v8 = vmov 0 }
  0xe8   :  { %vm4033_vm7 = vmpackc.low %vm130_vm2, %vm129_vm14  ;;  %3102 = vmatpush3.bf16.msra.mxu1 %v3510_v62  ;;  %v409_v34 = vpop.permute.xlu0 %408 }
  0xe9   :  { %v4951_v10 = vsel %vm4033_vm7, 4294967295, %v4950_v10  ;;  %2933 = vmatmul.mubr.msk.bf16.gmra.mxu0 %vm4033_vm7, %v3649_v43  ;;  %3103 = vmatprep.subr.bf16.mxu1 %v3513_v63  ;;  %vm235_vm7 = vcmp.eq.s32.totalorder %v3861_v35, %v4009_v21  ;;  %v4968_v21 = vmov 0  ;;  %v3519_v63 = vld [vmem:[#allocation2 + $0x2c0] ss:$12 sps:$4 sm:$0xff]  }
  0xeb   :  { %509 = vperm.xlu1 %3377, %v3765_v31   ;;  %v391_v3 = vpop.permute.xlu1 %390 }
  0xec   :  { %vm433_vm10 = vcmp.eq.s32.totalorder %v3861_v35, %v391_v3  ;;  %3104 = vmatpush3.bf16.msra.mxu1 %v3514_v11  ;;  %v4121_v42 = vpop.permute.xlu0 %414  ;;  %v3523_v11 = vld [vmem:[#allocation2 + $0x2a8] ss:$12 sps:$4 sm:$0xff]   ;;  %v4976_v3 = vmov 0 }
  0xed   :  { %vm4043_vm2 = vmpackc.low %vm434_vm9, %vm433_vm10  ;;  %3105 = vmatprep.subr.bf16.mxu1 %v3517_v4 }
  0xee   :  { %v4953_v15 = vsel %vm4043_vm2, 4294967295, %v4952_v15  ;;  %2947 = vmatprep.mubr.msk.bf16.mxu1 %vm4043_vm2, %v3649_v43 }
  0xef   :  { %3378 = vset.pattern.permute.xlu1 %v3646_v13  ;;  %v3525_v13 = vld [vmem:[#allocation2 + $0xc8] ss:$12 sps:$4 sm:$0xff]  }
  0xf0   :  { %429 = vperm.xlu1 %3378, %v3801_v60   ;;  %v287_v31 = vpop.permute.xlu1 %286  ;;  %3106 = vmatpush3.bf16.msra.mxu1 %v3518_v12  ;;  %v3526_v60 = vld [vmem:[#allocation2 + $0x8] ss:$12 sps:$4 sm:$0xff]   ;;  %v302_v49 = vpop.permute.xlu0 %301 }
  0xf1   :  { %3107 = vmatprep.subr.bf16.mxu1 %v3521_v18  ;;  %vm329_vm10 = vcmp.eq.s32.totalorder %v3861_v35, %v287_v31  ;;  %v3524_v12 = vld [vmem:[#allocation2 + $0x1e8] ss:$12 sps:$4 sm:$0xff]   ;;  %v3527_v18 = vld [vmem:[#allocation2 + $0x290] ss:$12 sps:$4 sm:$0xff]  }
  0xf4   :  { %3379 = vset.pattern.permute.xlu1 %v3647_v36  ;;  %v290_v22 = vpop.permute.xlu1 %289  ;;  %3108 = vmatpush3.bf16.msra.mxu1 %v3522_v19  ;;  %v308_v5 = vpop.permute.xlu0 %307  ;;  %v3528_v19 = vld [vmem:[#allocation2 + $0x1d0] ss:$12 sps:$4 sm:$0xff]  }
  0xf5   :  { %vm330_vm14 = vcmp.eq.s32.totalorder %v3861_v35, %v290_v22  ;;  %322 = vperm.xlu1 %3379, %v3843_v6   ;;  %3109 = vmatprep.subr.bf16.mxu1 %v3525_v13  ;;  %v3530_v22 = vld [vmem:[#allocation2 + $0x278] ss:$12 sps:$4 sm:$0xff]  }
  0xf6   :  { %vm4056_vm9 = vmpackc.low %vm330_vm14, %vm329_vm10  ;;  %vm132_vm14 = vcmp.eq.s32.totalorder %v3861_v35, %v3914_v9 }
  0xf7   :  { %v4955_v24 = vsel %vm4056_vm9, 4294967295, %v4954_v24  ;;  %2949 = vmatmul.mubr.msk.bf16.gmra.mxu1 %vm4056_vm9, %v3649_v43 }
  0xf8   :  { %3110 = vmatpush3.bf16.msra.mxu1 %v3526_v60  ;;  %v3531_v60 = vld [vmem:[#allocation2 + $0x1b8] ss:$12 sps:$4 sm:$0xff]  }
  0xf9   :  { %3381 = vset.pattern.permute.xlu1 %v3648_v7  ;;  %v216_v36 = vpop.permute.xlu1 %215  ;;  %3270 = vmatprep.subr.bf16.mxu1 %v4079_v27 }
  0xfa   :  { %vm236_vm2 = vcmp.eq.s32.totalorder %v3861_v35, %v216_v36  ;;  %512 = vperm.xlu1 %3381, %v3776_v41   ;;  %v4958_v41 = vmov 0  ;;  %v4978_v36 = vmov 0 }
  0xfb   :  { %vm4068_vm10 = vmpackc.low %vm236_vm2, %vm235_vm7 }
  0xfc   :  { %v4957_v25 = vsel %vm4068_vm10, 4294967295, %v4956_v25  ;;  %2935 = vmatprep.mubr.msk.bf16.mxu0 %vm4068_vm10, %v3649_v43 }
  0xfe   :  { %515 = vperm.xlu1 %3381, %v3787_v51   ;;  %v109_v7 = vpop.permute.xlu1 %108 }
  0xff   :  { %vm131_vm9 = vcmp.eq.s32.totalorder %v3861_v35, %v109_v7  ;;  %v3533_v7 = vld [vmem:[#allocation2 + $0x260] ss:$12 sps:$4 sm:$0xff]  }
 0x100   :  { %vm4081_vm13 = vmpackc.low %vm132_vm14, %vm131_vm9  ;;  %vm331_vm14 = vcmp.eq.s32.totalorder %v3861_v35, %v3922_v23  ;;  %v4964_v23 = vmov 0 }
 0x101   :  { %v4959_v41 = vsel %vm4081_vm13, 4294967295, %v4958_v41  ;;  %2937 = vmatmul.mubr.msk.bf16.gmra.mxu0 %vm4081_vm13, %v3649_v43 }
 0x102   :  { %521 = vperm.xlu1 %3381, %v3815_v16  }
 0x103   :  { %v397_v9 = vpop.permute.xlu1 %396 }
 0x104   :  { %vm435_vm7 = vcmp.eq.s32.totalorder %v3861_v35, %v397_v9 }
 0x106   :  { %524 = vperm.xlu1 %3381, %v3794_v56   ;;  %v4962_v56 = vmov 0 }
 0x107   :  { %v400_v51 = vpop.permute.xlu1 %399 }
 0x108   :  { %vm436_vm2 = vcmp.eq.s32.totalorder %v3861_v35, %v400_v51  ;;  %v3534_v51 = vld [vmem:[#allocation2 + $0x1a0] ss:$12 sps:$4 sm:$0xff]  }
 0x109   :  { %vm4093_vm9 = vmpackc.low %vm436_vm2, %vm435_vm7  ;;  %vm238_vm7 = vcmp.eq.s32.totalorder %v3861_v35, %v4014_v17  ;;  %v4972_v17 = vmov 0 }
 0x10a   :  { %v4961_v30 = vsel %vm4093_vm9, 4294967295, %v4960_v30  ;;  %530 = vperm.xlu1 %3381, %v3843_v6   ;;  %2951 = vmatprep.mubr.msk.bf16.mxu1 %vm4093_vm9, %v3649_v43 }
 0x10c   :  { %v296_v16 = vpop.permute.xlu1 %295 }
 0x10d   :  { %vm332_vm13 = vcmp.eq.s32.totalorder %v3861_v35, %v296_v16  ;;  %v314_v16 = vpop.permute.xlu0 %313 }
 0x10e   :  { %vm4104_vm10 = vmpackc.low %vm332_vm13, %vm331_vm14 }
 0x10f   :  { %v4963_v56 = vsel %vm4104_vm10, 4294967295, %v4962_v56  ;;  %2953 = vmatmul.mubr.msk.bf16.gmra.mxu1 %vm4104_vm10, %v3649_v43 }
 0x111   :  { %v219_v6 = vpop.permute.xlu1 %218 }
 0x112   :  { %vm237_vm2 = vcmp.eq.s32.totalorder %v3861_v35, %v219_v6  ;;  %v4980_v6 = vmov 0 }
 0x113   :  { %vm4114_vm9 = vmpackc.low %vm238_vm7, %vm237_vm2  ;;  %vm437_vm7 = vcmp.eq.s32.totalorder %v3861_v35, %v403_v32  ;;  %v3536_v32 = vld [vmem:[#allocation2 + $0x248] ss:$12 sps:$4 sm:$0xff]  }
 0x114   :  { %v4965_v23 = vsel %vm4114_vm9, 4294967295, %v4964_v23  ;;  %2939 = vmatprep.mubr.msk.bf16.mxu0 %vm4114_vm9, %v3649_v43 }
 0x116   :  { %v115_v37 = vpop.permute.xlu1 %114 }
 0x117   :  { %vm133_vm13 = vcmp.eq.s32.totalorder %v3861_v35, %v115_v37 }
 0x11a   :  { %v118_v20 = vpop.permute.xlu1 %117 }
 0x11b   :  { %vm134_vm14 = vcmp.eq.s32.totalorder %v3861_v35, %v118_v20  ;;  %v4982_v20 = vmov 0 }
 0x11c   :  { %vm4125_vm10 = vmpackc.low %vm134_vm14, %vm133_vm13  ;;  %vm334_vm13 = vcmp.eq.s32.totalorder %v3861_v35, %v302_v49 }
 0x11d   :  { %v4967_v45 = vsel %vm4125_vm10, 4294967295, %v4966_v45  ;;  %2941 = vmatmul.mubr.msk.bf16.gmra.mxu0 %vm4125_vm10, %v3649_v43 }
 0x11e   :  { %1666 = vmatprep.mubr.bf16.mxu0 %v3645_v1 }
 0x11f   :  { %v406_v46 = vpop.permute.xlu1 %405 }
 0x120   :  { %vm438_vm2 = vcmp.eq.s32.totalorder %v3861_v35, %v406_v46 }
 0x121   :  { %vm4135_vm9 = vmpackc.low %vm438_vm2, %vm437_vm7 }
 0x122   :  { %v4969_v21 = vsel %vm4135_vm9, 4294967295, %v4968_v21  ;;  %2955 = vmatprep.mubr.msk.bf16.mxu1 %vm4135_vm9, %v3649_v43 }
 0x124   :  { %v299_v52 = vpop.permute.xlu1 %298 }
 0x125   :  { %vm333_vm14 = vcmp.eq.s32.totalorder %v3861_v35, %v299_v52 }
 0x126   :  { %vm4144_vm10 = vmpackc.low %vm334_vm13, %vm333_vm14  ;;  %vm439_vm13 = vcmp.eq.s32.totalorder %v3861_v35, %v409_v34  ;;  %v3537_v34 = vld [vmem:[#allocation2 + $0x188] ss:$12 sps:$4 sm:$0xff]  }
 0x127   :  { %v4971_v53 = vsel %vm4144_vm10, 4294967295, %v4970_v53  ;;  %2957 = vmatmul.mubr.msk.bf16.gmra.mxu1 %vm4144_vm10, %v3649_v43 }
 0x129   :  { %v489_v54 = vpop.permute.xlu1 %488 }
 0x12a   :  { %vm535_vm7 = vcmp.eq.s32.totalorder %v3861_v35, %v489_v54  ;;  %v4984_v54 = vmov 0 }
 0x12d   :  { %v492_v55 = vpop.permute.xlu1 %491 }
 0x12e   :  { %vm536_vm2 = vcmp.eq.s32.totalorder %v3861_v35, %v492_v55 }
 0x12f   :  { %vm4153_vm9 = vmpackc.low %vm536_vm2, %vm535_vm7  ;;  %vm336_vm2 = vcmp.eq.s32.totalorder %v3861_v35, %v308_v5 }
 0x130   :  { %v4973_v17 = vsel %vm4153_vm9, 4294967295, %v4972_v17  ;;  %2975 = vmatmul.mubr.msk.bf16.vlgmr.msra.gmra.mxu0 %vm4153_vm9, %v3649_v43 }
 0x131   :  { %1676 = vmatprep.mubr.bf16.mxu0 %v3645_v1  ;;  %3160 = vmatpush3.bf16.msra.mxu0 %v3512_v57  ;;  %v4986_v57 = vmov 0 }
 0x132   :  { %v412_v62 = vpop.permute.xlu1 %411  ;;  %3161 = vmatprep.subr.bf16.mxu0 %v3515_v58 }
 0x133   :  { %vm440_vm14 = vcmp.eq.s32.totalorder %v3861_v35, %v412_v62 }
 0x134   :  { %vm4163_vm7 = vmpackc.low %vm440_vm14, %vm439_vm13 }
 0x135   :  { %v4975_v8 = vsel %vm4163_vm7, 4294967295, %v4974_v8  ;;  %2959 = vmatprep.mubr.msk.bf16.mxu1 %vm4163_vm7, %v3649_v43  ;;  %3162 = vmatpush3.bf16.msra.mxu0 %v3516_v61  ;;  %v4988_v61 = vmov 0 }
 0x136   :  { %3163 = vmatprep.subr.bf16.mxu0 %v3519_v63 }
 0x137   :  { %v305_v4 = vpop.permute.xlu1 %304 }
 0x138   :  { %vm335_vm9 = vcmp.eq.s32.totalorder %v3861_v35, %v305_v4 }
 0x139   :  { %vm4172_vm10 = vmpackc.low %vm336_vm2, %vm335_vm9  ;;  %3164 = vmatpush3.bf16.msra.mxu0 %v3520_v2  ;;  %vm441_vm2 = vcmp.eq.s32.totalorder %v3861_v35, %v4121_v42  ;;  %v320_v42 = vpop.permute.xlu0 %319  ;;  %v4990_v2 = vmov 0 }
 0x13a   :  { %v4977_v3 = vsel %vm4172_vm10, 4294967295, %v4976_v3  ;;  %2961 = vmatmul.mubr.msk.bf16.gmra.mxu1 %vm4172_vm10, %v3649_v43  ;;  %3165 = vmatprep.subr.bf16.mxu0 %v3523_v11 }
 0x13c   :  { %v495_v31 = vpop.permute.xlu1 %494 }
 0x13d   :  { %3166 = vmatpush3.bf16.msra.mxu0 %v3524_v12  ;;  %vm537_vm13 = vcmp.eq.s32.totalorder %v3861_v35, %v495_v31  ;;  %v421_v52 = vpop.permute.xlu0 %420  ;;  %v4992_v12 = vmov 0  ;;  %v3550_v31 = vld [vmem:[#allocation5 + $0x20] sm:$0xff]  }
 0x13e   :  { %3167 = vmatprep.subr.bf16.mxu0 %v3527_v18 }
 0x140   :  { %v498_v13 = vpop.permute.xlu1 %497 }
 0x141   :  { %vm538_vm9 = vcmp.eq.s32.totalorder %v3861_v35, %v498_v13  ;;  %3168 = vmatpush3.bf16.msra.mxu0 %v3528_v19  ;;  %v427_v5 = vpop.permute.xlu0 %426  ;;  %v3532_v13 = vld [vmem:[#allocation2 + $0x398] ss:$12 sps:$4 sm:$0xff]  }
 0x142   :  { %vm4181_vm14 = vmpackc.low %vm538_vm9, %vm537_vm13  ;;  %3169 = vmatprep.subr.bf16.mxu0 %v3530_v22  ;;  %vm338_vm9 = vcmp.eq.s32.totalorder %v3861_v35, %v314_v16  ;;  %v3538_v16 = vld [vmem:[#allocation2 + $0x368] ss:$12 sps:$4 sm:$0xff]  }
 0x143   :  { %v4979_v36 = vsel %vm4181_vm14, 4294967295, %v4978_v36  ;;  %2977 = vmatmul.mubr.msk.bf16.gmra.mxu0 %vm4181_vm14, %v3649_v43 }
 0x144   :  { %1686 = vmatprep.mubr.bf16.mxu0 %v3645_v1 }
 0x145   :  { %v418_v9 = vpop.permute.xlu1 %417  ;;  %3170 = vmatpush3.bf16.msra.mxu0 %v3531_v60  ;;  %v326_v4 = vpop.permute.xlu0 %325 }
 0x146   :  { %vm442_vm10 = vcmp.eq.s32.totalorder %v3861_v35, %v418_v9  ;;  %3171 = vmatprep.subr.bf16.mxu0 %v3533_v7  ;;  %v3535_v9 = vld [vmem:[#allocation2 + $0x380] ss:$12 sps:$4 sm:$0xff]  }
 0x147   :  { %vm4192_vm13 = vmpackc.low %vm442_vm10, %vm441_vm2 }
 0x148   :  { %v4981_v6 = vsel %vm4192_vm13, 4294967295, %v4980_v6  ;;  %2963 = vmatprep.mubr.msk.bf16.mxu1 %vm4192_vm13, %v3649_v43 }
 0x149   :  { %3172 = vmatpush3.bf16.msra.mxu0 %v3534_v51  ;;  %v519_v51 = vpop.permute.xlu0 %518 }
 0x14a   :  { %v311_v37 = vpop.permute.xlu1 %310  ;;  %3173 = vmatprep.subr.bf16.mxu0 %v3536_v32 }
 0x14b   :  { %vm337_vm14 = vcmp.eq.s32.totalorder %v3861_v35, %v311_v37 }
 0x14c   :  { %vm4201_vm7 = vmpackc.low %vm338_vm9, %vm337_vm14  ;;  %vm443_vm14 = vcmp.eq.s32.totalorder %v3861_v35, %v421_v52  ;;  %v4321_v52 = vshrl.u32 %v69_v14, 7  ;;  %v3547_v14 = vld [vmem:[#allocation5 + $0x68] sm:$0xff]  }
 0x14d   :  { %v4983_v20 = vsel %vm4201_vm7, 4294967295, %v4982_v20  ;;  %2965 = vmatmul.mubr.msk.bf16.gmra.mxu1 %vm4201_vm7, %v3649_v43  ;;  %3174 = vmatpush3.bf16.msra.mxu0 %v3537_v34  ;;  %v3539_v34 = vld [vmem:[#allocation2 + $0x350] ss:$12 sps:$4 sm:$0xff]   ;;  %v528_v37 = vpop.permute.xlu0 %527 }
 0x14f   :  { %v501_v46 = vpop.permute.xlu1 %500 }
 0x150   :  { %vm539_vm10 = vcmp.eq.s32.totalorder %v3861_v35, %v501_v46  ;;  %v3540_v46 = vld [vmem:[#allocation2 + $0x338] ss:$12 sps:$4 sm:$0xff]  }
 0x151   :  { %v534_v29 = vpop.permute.xlu0 %533 }
 0x153   :  { %v504_v49 = vpop.permute.xlu1 %503 }
 0x154   :  { %vm540_vm2 = vcmp.eq.s32.totalorder %v3861_v35, %v504_v49 }
 0x155   :  { %vm4210_vm13 = vmpackc.low %vm540_vm2, %vm539_vm10  ;;  %vm340_vm10 = vcmp.eq.s32.totalorder %v3861_v35, %v320_v42 }
 0x156   :  { %v4985_v54 = vsel %vm4210_vm13, 4294967295, %v4984_v54  ;;  %2979 = vmatmul.mubr.msk.bf16.gmra.mxu0 %vm4210_vm13, %v3649_v43 }
 0x157   :  { %1696 = vmatprep.mubr.bf16.mxu0 %v3645_v1 }
 0x158   :  { %v424_v55 = vpop.permute.xlu1 %423 }
 0x159   :  { %vm444_vm9 = vcmp.eq.s32.totalorder %v3861_v35, %v424_v55 }
 0x15a   :  { %vm4220_vm7 = vmpackc.low %vm444_vm9, %vm443_vm14 }
 0x15b   :  { %v4987_v57 = vsel %vm4220_vm7, 4294967295, %v4986_v57  ;;  %2967 = vmatprep.mubr.msk.bf16.mxu1 %vm4220_vm7, %v3649_v43 }
 0x15d   :  { %v317_v58 = vpop.permute.xlu1 %316 }
 0x15e   :  { %vm339_vm2 = vcmp.eq.s32.totalorder %v3861_v35, %v317_v58  ;;  %v3541_v58 = vld [vmem:[#allocation2 + $0x320] ss:$12 sps:$4 sm:$0xff]  }
 0x15f   :  { %vm4229_vm13 = vmpackc.low %vm340_vm10, %vm339_vm2  ;;  %vm445_vm10 = vcmp.eq.s32.totalorder %v3861_v35, %v427_v5  ;;  %v759_v5 = vsub.s32 1, %v4321_v52 }
 0x160   :  { %v4989_v61 = vsel %vm4229_vm13, 4294967295, %v4988_v61  ;;  %2969 = vmatmul.mubr.msk.bf16.gmra.mxu1 %vm4229_vm13, %v3649_v43 }
 0x162   :  { %v507_v62 = vpop.permute.xlu1 %506 }
 0x163   :  { %vm541_vm14 = vcmp.eq.s32.totalorder %v3861_v35, %v507_v62  ;;  %v4276_v7 = vpop.f32.mrf.mxu0  ;;  %v755_v62 = vsub.s32 0, %v4321_v52 }
 0x165   :  { %v1444_v0 = vpop.f32.mrf.mxu0 }
 0x166   :  { %v510_v63 = vpop.permute.xlu1 %509 }
 0x167   :  { %vm542_vm9 = vcmp.eq.s32.totalorder %v3861_v35, %v510_v63  ;;  %v1446_v47 = vpop.f32.mrf.mxu0 }
 0x168   :  { %vm4238_vm7 = vmpackc.low %vm542_vm9, %vm541_vm14  ;;  %vm342_vm14 = vcmp.eq.s32.totalorder %v3861_v35, %v326_v4 }
 0x169   :  { %v4991_v2 = vsel %vm4238_vm7, 4294967295, %v4990_v2  ;;  %2981 = vmatmul.mubr.msk.bf16.gmra.mxu0 %vm4238_vm7, %v3649_v43  ;;  %v1448_v42 = vpop.f32.mrf.mxu0 }
 0x16a   :  { %1706 = vmatprep.mubr.bf16.mxu0 %v3645_v1 }
 0x16b   :  { %v430_v11 = vpop.permute.xlu1 %429 }
 0x16c   :  { %vm446_vm2 = vcmp.eq.s32.totalorder %v3861_v35, %v430_v11 }
 0x16d   :  { %vm4248_vm13 = vmpackc.low %vm446_vm2, %vm445_vm10 }
 0x16e   :  { %v4993_v12 = vsel %vm4248_vm13, 4294967295, %v4992_v12  ;;  %2971 = vmatprep.mubr.msk.bf16.mxu1 %vm4248_vm13, %v3649_v43 }
 0x16f   :  { %v4304_v59 = vpop.f32.mrf.mxu0 }
 0x170   :  { %v323_v18 = vpop.permute.xlu1 %322 }
 0x171   :  { %vm341_vm9 = vcmp.eq.s32.totalorder %v3861_v35, %v323_v18  ;;  %v1454_v55 = vpop.f32.mrf.mxu0 }
 0x172   :  { %vm4257_vm7 = vmpackc.low %vm342_vm14, %vm341_vm9 }
 0x173   :  { %2973 = vmatmul.mubr.msk.bf16.gmra.mxu1 %vm4257_vm7, %v3649_v43  ;;  %v1456_v63 = vpop.f32.mrf.mxu0 }
 0x174   :  { %2991 = vmatprep.mubr.msk.bf16.mxu1 %vm3873_vm5, %v3649_v43 }
 0x175   :  { %v513_v19 = vpop.permute.xlu1 %512  ;;  %v1458_v11 = vpop.f32.mrf.mxu0 }
 0x176   :  { %vm543_vm10 = vcmp.eq.s32.totalorder %v3861_v35, %v513_v19 }
 0x179   :  { %v516_v22 = vpop.permute.xlu1 %515 }
 0x17a   :  { %vm544_vm2 = vcmp.eq.s32.totalorder %v3861_v35, %v516_v22 }
 0x17b   :  { %vm4269_vm13 = vmpackc.low %vm544_vm2, %vm543_vm10  ;;  %2993 = vmatmul.mubr.msk.bf16.vlgmr.msra.gmra.mxu1 %vm3869_vm4, %v3649_v43  ;;  %vm545_vm4 = vcmp.eq.s32.totalorder %v3861_v35, %v519_v51  ;;  %vm5007_vm10 = vnez %v4953_v15  ;;  %vm5008_vm2 = vnez %v4951_v10 }
 0x17c   :  { %2983 = vmatmul.mubr.msk.bf16.gmra.mxu0 %vm4269_vm13, %v3649_v43  ;;  %2995 = vmatprep.mubr.msk.bf16.mxu1 %vm3887_vm8, %v3649_v43  ;;  %vm548_vm8 = vcmp.eq.s32.totalorder %v3861_v35, %v528_v37 }
 0x17d   :  { %v522_v40 = vpop.permute.xlu1 %521  ;;  %3271 = vmatpush3.bf16.msra.mxu1 %v4079_v27  ;;  %1716 = vmatprep.mubr.bf16.mxu0 %v3645_v1 }
 0x17e   :  { %3272 = vmatprep.subr.bf16.mxu1 %v3532_v13  ;;  %vm546_vm5 = vcmp.eq.s32.totalorder %v3861_v35, %v522_v40 }
 0x17f   :  { %vm4288_vm14 = vmpackc.low %vm546_vm5, %vm545_vm4  ;;  %vm5009_vm4 = vnez %v4957_v25  ;;  %vm5010_vm5 = vnez %v4955_v24 }
 0x181   :  { %3273 = vmatpush3.bf16.msra.mxu1 %v3532_v13  ;;  %v525_v27 = vpop.permute.xlu1 %524 }
 0x182   :  { %3274 = vmatprep.subr.bf16.mxu1 %v3535_v9 }
 0x183   :  { %2997 = vmatmul.mubr.msk.bf16.gmra.mxu1 %vm3901_vm11, %v3649_v43  ;;  %vm547_vm11 = vcmp.eq.s32.totalorder %v3861_v35, %v525_v27 }
 0x184   :  { %2985 = vmatmul.mubr.msk.bf16.gmra.mxu0 %vm4288_vm14, %v3649_v43  ;;  %2999 = vmatprep.mubr.msk.bf16.mxu1 %vm3931_vm0, %v3649_v43  ;;  %vm4306_vm9 = vmpackc.low %vm548_vm8, %vm547_vm11  ;;  %vm5011_vm8 = vnez %v4961_v30  ;;  %vm5012_vm11 = vnez %v4959_v41 }
 0x185   :  { %1726 = vmatprep.mubr.bf16.mxu0 %v3645_v1  ;;  %3275 = vmatpush3.bf16.msra.mxu1 %v3535_v9  ;;  %v531_v49 = vpop.permute.xlu1 %530 }
 0x186   :  { %3276 = vmatprep.subr.bf16.mxu1 %v3538_v16  ;;  %vm549_vm0 = vcmp.eq.s32.totalorder %v3861_v35, %v531_v49 }
 0x189   :  { %3277 = vmatpush3.bf16.msra.mxu1 %v3538_v16 }
 0x18a   :  { %3278 = vmatprep.subr.bf16.mxu1 %v3539_v34  ;;  %v4350_v4 = vpop.f32.mrf.mxu0 }
 0x18b   :  { %3001 = vmatmul.mubr.msk.bf16.gmra.mxu1 %vm3935_vm1, %v3649_v43  ;;  %vm550_vm1 = vcmp.eq.s32.totalorder %v3861_v35, %v534_v29 }
 0x18c   :  { %2987 = vmatmul.mubr.msk.bf16.gmra.mxu0 %vm4306_vm9, %v3649_v43  ;;  %3003 = vmatprep.mubr.msk.bf16.mxu1 %vm3949_vm6, %v3649_v43  ;;  %vm4329_vm6 = vmpackc.low %vm550_vm1, %vm549_vm0  ;;  %v4358_v44 = vpop.f32.mrf.mxu0  ;;  %vm5013_vm0 = vnez %v4965_v23  ;;  %vm5014_vm1 = vnez %v4963_v56 }
 0x18d   :  { %1736 = vmatprep.mubr.bf16.mxu0 %v3645_v1  ;;  %3279 = vmatpush3.bf16.msra.mxu1 %v3539_v34  ;;  %v751_v1 = vld [vmem:[%s4894_s2] sm:$0x7] }
 0x18e   :  { %3280 = vmatprep.subr.bf16.mxu1 %v3540_v46  ;;  %v4346_v35 = vrot.slane %v751_v1, %v755_v62  ;;  %v4348_v38 = vrot.slane %v751_v1, %v759_v5  ;;  %v1466_v51 = vpop.f32.mrf.mxu0  ;;  %v3544_v62 = vld [vmem:[#allocation5 + $0x38] sm:$0xff]   ;;  %v3546_v1 = vld [vmem:[#allocation5 + $0x30] sm:$0xff]  }
 0x190   :  { %v1443_v18 = vadd.f32 %v4276_v7, %v4346_v35  ;;  %v1445_v39 = vadd.f32 %v1444_v0, %v4348_v38  ;;  %v1449_v9 = vadd.f32 %v1448_v42, %v4348_v38  ;;  %v1453_v41 = vadd.f32 %v4304_v59, %v4346_v35 }
 0x191   :  { %3281 = vmatpush3.bf16.msra.mxu1 %v3540_v46  ;;  %v1455_v56 = vadd.f32 %v1454_v55, %v4348_v38  ;;  %v1467_v32 = vadd.f32 %v1466_v51, %v4346_v35 }
 0x192   :  { %3282 = vmatprep.subr.bf16.mxu1 %v3541_v58 }
 0x193   :  { %3005 = vmatmul.mubr.msk.bf16.gmra.mxu1 %vm3961_vm12, %v3649_v43  ;;  %vm5004_vm12 = vnez %v4945_v48  ;;  %v1447_v48 = vadd.f32 %v1446_v47, %v4346_v35 }
 0x194   :  { %2989 = vmatmul.mubr.msk.bf16.gmra.mxu0 %vm4329_vm6, %v3649_v43  ;;  %3007 = vmatprep.mubr.msk.bf16.mxu1 %vm3968_vm15, %v3649_v43  ;;  %vm5005_vm15 = vnez %v4949_v26 }
 0x195   :  { %3023 = vmatprep.mubr.msk.bf16.mxu0 %vm3983_vm3, %v3649_v43  ;;  %3283 = vmatpush3.bf16.msra.mxu1 %v3541_v58  ;;  %vm5006_vm3 = vnez %v4947_v50  ;;  %v4382_v50 = vpop.f32.mrf.mxu0  ;;  %v3543_v58 = vld [vmem:[#allocation5 + $0x78] sm:$0xff]  }
 0x196   :  { %3284 = vmatprep.subr.bf16.mxu1 %v3542_v33 }
 0x197   :  { %v4393_v15 = vpop.f32.mrf.mxu0 }
 0x199   :  { %3285 = vmatpush3.bf16.msra.mxu1 %v3542_v33  ;;  %v4398_v10 = vpop.f32.mrf.mxu0 }
 0x19a   :  { %3239 = vmatprep.subr.bf16.mxu1 %v3543_v58 }
 0x19b   :  { %v1555_v19 = vpop.f32.mrf.mxu1  ;;  %3009 = vmatmul.mubr.msk.bf16.gmra.mxu1 %vm5004_vm12, %v3649_v43  ;;  %vm5015_vm12 = vnez %v4969_v21  ;;  %v4409_v24 = vpop.f32.mrf.mxu0 }
 0x19c   :  { %v4360_v22 = vadd.f32 %v1555_v19, %v1443_v18  ;;  %3011 = vmatprep.mubr.msk.bf16.mxu1 %vm5005_vm15, %v3649_v43  ;;  %3025 = vmatmul.mubr.msk.bf16.vlgmr.msra.gmra.mxu0 %vm5006_vm3, %v3649_v43  ;;  %vm5016_vm15 = vnez %v4967_v45  ;;  %vm5017_vm3 = vnez %v4971_v53  ;;  %v1457_v53 = vadd.f32 %v1456_v63, %v4346_v35  ;;  %v3545_v63 = vld [vmem:[#allocation5 + $0x70] sm:$0xff]   ;;  %v3551_v19 = vld [vmem:[#allocation5 + $0x58] sm:$0xff]  }
 0x19d   :  { %v1557_v13 = vpop.f32.mrf.mxu1  ;;  %3027 = vmatprep.mubr.msk.bf16.mxu0 %vm5007_vm10, %v3649_v43  ;;  %v4414_v25 = vpop.f32.mrf.mxu0  ;;  %vm5018_vm10 = vnez %v4973_v17 }
 0x19e   :  { %v4372_v7 = vadd.f32 %v1557_v13, %v1445_v39  ;;  %v3552_v39 = vld [vmem:[#allocation5 + $0x18] sm:$0xff]   ;;  %v3553_v13 = vld [vmem:[#allocation5 + $0x50] sm:$0xff]  }
 0x19f   :  { %v1559_v40 = vpop.f32.mrf.mxu1  ;;  %v4428_v23 = vpop.f32.mrf.mxu0 }
 0x1a0   :  { %v4375_v0 = vadd.f32 %v1559_v40, %v1447_v48  ;;  %v3554_v48 = vld [vmem:[#allocation5 + $0x10] sm:$0xff]  }
 0x1a1   :  { %v1561_v26 = vpop.f32.mrf.mxu1  ;;  %v4439_v27 = vpop.f32.mrf.mxu0 }
 0x1a2   :  { %v4377_v16 = vadd.f32 %v1561_v26, %v1449_v9  ;;  %v3555_v9 = vld [vmem:[#allocation5 + $0x48] sm:$0xff]  }
 0x1a3   :  { %3013 = vmatmul.mubr.msk.bf16.gmra.mxu1 %vm5008_vm2, %v3649_v43  ;;  %vm5019_vm2 = vnez %v4975_v8  ;;  %v1459_v8 = vadd.f32 %v1458_v11, %v4348_v38  ;;  %v4454_v42 = vpop.f32.mrf.mxu0  ;;  %v3548_v11 = vld [vmem:[#allocation5 + $0x28] sm:$0xff]  }
 0x1a4   :  { %3015 = vmatprep.mubr.msk.bf16.mxu1 %vm5009_vm4, %v3649_v43  ;;  %3029 = vmatmul.mubr.msk.bf16.gmra.mxu0 %vm5010_vm5, %v3649_v43  ;;  %vm5020_vm4 = vnez %v4979_v36  ;;  %vm5021_vm5 = vnez %v4977_v3  ;;  %v3556_v26 = vld [vmem:[#allocation5 + $0x8] sm:$0xff]  }
 0x1a5   :  { %3031 = vmatprep.mubr.msk.bf16.mxu0 %vm5011_vm8, %v3649_v43  ;;  %vm5022_vm8 = vnez %v4985_v54  ;;  %v4459_v59 = vpop.f32.mrf.mxu0 }
 0x1a9   :  { %v4470_v3 = vpop.f32.mrf.mxu0 }
 0x1ab   :  { %3017 = vmatmul.mubr.msk.bf16.gmra.mxu1 %vm5012_vm11, %v3649_v43  ;;  %vm5023_vm11 = vnez %v4981_v6  ;;  %v4472_v6 = vpop.f32.mrf.mxu0 }
 0x1ac   :  { %3019 = vmatprep.mubr.msk.bf16.mxu1 %vm5013_vm0, %v3649_v43  ;;  %3033 = vmatmul.mubr.msk.bf16.gmra.mxu0 %vm5014_vm1, %v3649_v43  ;;  %vm5024_vm0 = vnez %v4991_v2  ;;  %vm5025_vm1 = vnez %v4983_v20  ;;  %v1463_v20 = vadd.f32 %v4350_v4, %v4346_v35  ;;  %v1465_v2 = vadd.f32 %v4358_v44, %v4348_v38 }
 0x1ad   :  { %3035 = vmatprep.mubr.msk.bf16.mxu0 %vm5015_vm12, %v3649_v43  ;;  %vm5026_vm12 = vnez %v4987_v57  ;;  %v4488_v54 = vpop.f32.mrf.mxu0 }
 0x1af   :  { %v4495_v46 = vpop.f32.mrf.mxu0 }
 0x1b3   :  { %3021 = vmatmul.mubr.msk.bf16.gmra.mxu1 %vm5016_vm15, %v3649_v43  ;;  %vm5027_vm15 = vnez %v4989_v61 }
 0x1b4   :  { %3037 = vmatmul.mubr.msk.bf16.gmra.mxu0 %vm5017_vm3, %v3649_v43  ;;  %3286 = vmatprep.mubr.msk.bf16.mxu1 %vm5018_vm10, %v3649_v43  ;;  %vm2441_vm3 = vcmask 1044484   ;;  %vm2443_vm10 = vcmask 1045509  }
 0x1b5   :  { %3039 = vmatprep.mubr.msk.bf16.mxu0 %vm5019_vm2, %v3649_v43  ;;  %vm2445_vm2 = vcmask 1046534  }
 0x1b7   :  { %v1565_v30 = vpop.f32.mrf.mxu1 }
 0x1b8   :  { %v4430_v45 = vadd.f32 %v1565_v30, %v1453_v41 }
 0x1b9   :  { %v1567_v21 = vpop.f32.mrf.mxu1 }
 0x1ba   :  { %v4433_v47 = vadd.f32 %v1567_v21, %v1455_v56  ;;  %v3557_v21 = vld [vmem:[#allocation5 + $0x40] sm:$0xff]  }
 0x1bb   :  { %v1569_v17 = vpop.f32.mrf.mxu1  ;;  %3287 = vmatmul.mubr.msk.bf16.vlgmr.msra.gmra.mxu1 %vm5020_vm4, %v3649_v43  ;;  %vm2447_vm4 = vcmask 1047559  }
 0x1bc   :  { %v4441_v34 = vadd.f32 %v1569_v17, %v1457_v53  ;;  %3041 = vmatmul.mubr.msk.bf16.gmra.mxu0 %vm5021_vm5, %v3649_v43  ;;  %3290 = vmatprep.mubr.msk.bf16.mxu1 %vm5022_vm8, %v3649_v43  ;;  %v3558_v17 = vld [vmem:[#allocation5] sm:$0xff]  }
 0x1bd   :  { %v1571_v37 = vpop.f32.mrf.mxu1  ;;  %3043 = vmatprep.mubr.msk.bf16.mxu0 %vm5023_vm11, %v3649_v43  ;;  %3240 = vmatpush3.bf16.msra.mxu1 %v3544_v62 }
 0x1be   :  { %v4452_v36 = vadd.f32 %v1571_v37, %v1459_v8  ;;  %3241 = vmatprep.subr.bf16.mxu1 %v3545_v63 }
 0x1c1   :  { %v4502_v49 = vpop.f32.mrf.mxu0  ;;  %3242 = vmatpush3.bf16.msra.mxu1 %v3546_v1 }
 0x1c2   :  { %3243 = vmatprep.subr.bf16.mxu1 %v3547_v14 }
 0x1c3   :  { %3291 = vmatmul.mubr.msk.bf16.gmra.mxu1 %vm5024_vm0, %v3649_v43  ;;  %v4509_v29 = vpop.f32.mrf.mxu0 }
 0x1c4   :  { %3045 = vmatmul.mubr.msk.bf16.gmra.mxu0 %vm5025_vm1, %v3649_v43  ;;  %3294 = vmatprep.mubr.msk.bf16.mxu1 %vm4269_vm13, %v3649_v43  ;;  %vm5028_vm13 = vnez %v4993_v12 }
 0x1c5   :  { %3047 = vmatprep.mubr.msk.bf16.mxu0 %vm5026_vm12, %v3649_v43  ;;  %v4511_v33 = vpop.f32.mrf.mxu0  ;;  %3244 = vmatpush3.bf16.msra.mxu1 %v3548_v11 }
 0x1c7   :  { %v4513_v5 = vpop.f32.mrf.mxu0 }
 0x1cb   :  { %3295 = vmatmul.mubr.msk.bf16.gmra.mxu1 %vm4288_vm14, %v3649_v43  ;;  %vm2437_vm14 = vcmask 1042434  }
 0x1cc   :  { %3049 = vmatmul.mubr.msk.bf16.gmra.mxu0 %vm5027_vm15, %v3649_v43  ;;  %3298 = vmatprep.mubr.msk.bf16.mxu1 %vm4306_vm9, %v3649_v43  ;;  %vm3651_vm9 = vmmov 0  }
 0x1cd   :  { %3051 = vmatprep.mubr.msk.bf16.mxu0 %vm5028_vm13, %v3649_v43 }
 0x1cf   :  { %v1575_v57 = vpop.f32.mrf.mxu1 }
 0x1d0   :  { %v4492_v60 = vadd.f32 %v1575_v57, %v1463_v20  ;;  %v4529_v20 = vld [vmem:[%s4895_s3] sm:$0xff] }
 0x1d1   :  { %v1577_v61 = vpop.f32.mrf.mxu1 }
 0x1d2   :  { %v4497_v28 = vadd.f32 %v1577_v61, %v1465_v2 }
 0x1d3   :  { %v1579_v12 = vpop.f32.mrf.mxu1  ;;  %3299 = vmatmul.mubr.msk.bf16.gmra.mxu1 %vm4329_vm6, %v3649_v43  ;;  %vm2439_vm6 = vcmask 1043459  }
 0x1d4   :  { %v4504_v55 = vadd.f32 %v1579_v12, %v1467_v32  ;;  %3053 = vmatmul.mubr.msk.bf16.gmra.mxu0 %vm4257_vm7, %v3649_v43  ;;  %v3549_v43 = vld [vmem:[#allocation5 + $0x60] sm:$0xff]   ;;  %vm2435_vm7 = vcmask 1041409  }
 0x1d5   :  { %3245 = vmatprep.subr.bf16.mxu1 %v3549_v43  ;;  %v4545_v32 = vld [vmem:[%s4895_s3 + $0x20] sm:$0xff]  ;;  %v4547_v12 = vpop.f32.mrf.mxu1  ;;  %v3559_v43 = vld [vmem:[#allocation5 + $0xb8] sm:$0xff]  }
 0x1d6   :  { %3246 = vmatpush3.bf16.msra.mxu1 %v3550_v31 }
 0x1d7   :  { %3247 = vmatprep.subr.bf16.mxu1 %v3551_v19  ;;  %v3650_v19 = vmov 0.0  }
 0x1d8   :  { %3302 = vmatprep.subr.bf16.mxu0 %v3650_v19  ;;  %3318 = vmatprep.mubr.msk.bf16.mxu0 %vm3651_vm9, %v3650_v19 }
 0x1d9   :  { %3303 = vmatpush3.bf16.msra.mxu0 %v3559_v43 }
 0x1da   :  { %3248 = vmatpush3.bf16.msra.mxu1 %v3552_v39  ;;  %3304 = vmatprep.subr.bf16.mxu0 %v3650_v19 }
 0x1db   :  { %3249 = vmatprep.subr.bf16.mxu1 %v3553_v13 }
 0x1dd   :  { %v4515_v4 = vpop.f32.mrf.mxu0 }
 0x1de   :  { %3250 = vmatpush3.bf16.msra.mxu1 %v3554_v48 }
 0x1df   :  { %v4517_v18 = vpop.f32.mrf.mxu0  ;;  %3251 = vmatprep.subr.bf16.mxu1 %v3555_v9 }
 0x1e1   :  { %v4519_v44 = vpop.f32.mrf.mxu0 }
 0x1e2   :  { %3252 = vmatpush3.bf16.msra.mxu1 %v3556_v26 }
 0x1e3   :  { %v4521_v40 = vpop.f32.mrf.mxu0  ;;  %3253 = vmatprep.subr.bf16.mxu1 %v3557_v21 }
 0x1e6   :  { %3254 = vmatpush3.bf16.msra.mxu1 %v3558_v17 }
 0x1e7   :  { %v4551_v1 = vpop.f32.mrf.mxu1 }
 0x1e9   :  { %v4556_v39 = vpop.f32.mrf.mxu1 }
 0x1eb   :  { %v4559_v48 = vpop.f32.mrf.mxu1 }
 0x1ed   :  { %v4563_v21 = vpop.f32.mrf.mxu1 }
 0x1f0   :  { %v1668_v51 = vpop.f32.mrf.mxu0 }
 0x1f1   :  { %v1669_v41 = vadd.f32 %v1668_v51, %v4360_v22  ;;  %v4534_v22 = vld [vmem:[%s4895_s3 + $0x18] sm:$0xff] }
 0x1f2   :  { %v1670_v30 = vpop.f32.mrf.mxu0 }
 0x1f3   :  { %v1671_v56 = vadd.f32 %v1670_v30, %v4372_v7  ;;  %v2038_v8 = vmax.f32 %v1669_v41, 0.0 }
 0x1f4   :  { %v1672_v53 = vpop.f32.mrf.mxu0 }
 0x1f5   :  { %v1673_v37 = vadd.f32 %v1672_v53, %v4375_v0  ;;  %v2039_v7 = vmax.f32 %v1671_v56, 0.0  ;;  %v4540_v0 = vld [vmem:[%s4895_s3 + $0x8] sm:$0xff]  ;;  %v2092_v58 = vmul.f32 %v4529_v20, %v2038_v8 }
 0x1f6   :  { %v1674_v57 = vpop.f32.mrf.mxu0 }
 0x1f7   :  { %v2041_v2 = vmax.f32 %v1673_v37, 0.0  ;;  %v1675_v61 = vadd.f32 %v1674_v57, %v4377_v16  ;;  %v2093_v16 = vmul.f32 %v4540_v0, %v2039_v7 }
 0x1f9   :  { %v2095_v62 = vmul.f32 %v4534_v22, %v2041_v2  ;;  %v2042_v63 = vmax.f32 %v1675_v61, 0.0 }
 0x1fa   :  { %v4566_v57 = vpop.f32.mrf.mxu1 }
 0x1fb   :  { %v2140_v14 = vmax.f32 %v2092_v58, %v2095_v62  ;;  %v2096_v11 = vmul.f32 %v4545_v32, %v2042_v63 }
 0x1fd   :  { %v2147_v31 = vmax.f32 %v2093_v16, %v2096_v11  ;;  %v2141_v13 = vrot.slane %v2140_v14, 4 }
 0x1ff   :  { %v2148_v51 = vrot.slane %v2147_v31, 4  ;;  %v2142_v30 = vmax.f32 %v2140_v14, %v2141_v13  ;;  %v4571_v14 = vpop.f32.mrf.mxu1 }
 0x201   :  { %v2149_v17 = vmax.f32 %v2147_v31, %v2148_v51  ;;  %v2143_v2 = vrot.slane %v2142_v30, 2 }
 0x203   :  { %v1678_v9 = vpop.f32.mrf.mxu0  ;;  %v2144_v11 = vmax.f32 %v2142_v30, %v2143_v2 }
 0x204   :  { %v1679_v26 = vadd.f32 %v1678_v9, %v4430_v45  ;;  %v2150_v45 = vrot.slane %v2149_v17, 2 }
 0x205   :  { %v1680_v41 = vpop.f32.mrf.mxu0 }
 0x206   :  { %v1681_v56 = vadd.f32 %v1680_v41, %v4433_v47  ;;  %v2044_v8 = vmax.f32 %v1679_v26, 0.0  ;;  %v2151_v13 = vmax.f32 %v2149_v17, %v2150_v45  ;;  %v4575_v26 = vpop.f32.mrf.mxu1 }
 0x207   :  { %v1682_v53 = vpop.f32.mrf.mxu0 }
 0x208   :  { %v1683_v37 = vadd.f32 %v1682_v53, %v4441_v34  ;;  %v2045_v61 = vmax.f32 %v1681_v56, 0.0  ;;  %v2098_v63 = vmul.f32 %v4529_v20, %v2044_v8  ;;  %v2152_v53 = vrot.slane %v2151_v13, 1 }
 0x209   :  { %v1684_v7 = vpop.f32.mrf.mxu0 }
 0x20a   :  { %v2047_v58 = vmax.f32 %v1683_v37, 0.0  ;;  %v1685_v62 = vadd.f32 %v1684_v7, %v4452_v36  ;;  %v2099_v43 = vmul.f32 %v4540_v0, %v2045_v61  ;;  %v2145_v36 = vrot.slane %v2144_v11, 1  ;;  %v4577_v7 = vpop.f32.mrf.mxu1 }
 0x20b   :  { %v2153_v45 = vmax.f32 %v2151_v13, %v2152_v53 }
 0x20c   :  { %v2101_v47 = vmul.f32 %v4534_v22, %v2047_v58  ;;  %v2048_v16 = vmax.f32 %v1685_v62, 0.0  ;;  %v2146_v58 = vmax.f32 %v2144_v11, %v2145_v36  ;;  %v3560_v36 = vld [vmem:[#allocation5 + $0xb0] sm:$0xff]  }
 0x20d   :  { %v4579_v62 = vpop.f32.mrf.mxu1  ;;  %v2309_v13 = vpack.c.bf16 %v2153_v45, %v2153_v45  ;;  %3305 = vmatpush3.bf16.msra.mxu0 %v3560_v36 }
 0x20e   :  { %v2161_v34 = vmax.f32 %v2098_v63, %v2101_v47  ;;  %v2102_v31 = vmul.f32 %v4545_v32, %v2048_v16  ;;  %3306 = vmatprep.subr.bf16.mxu0 %v3650_v19 }
 0x210   :  { %v2162_v9 = vrot.slane %v2161_v34, 4  ;;  %v2168_v51 = vmax.f32 %v2099_v43, %v2102_v31  ;;  %v1469_v43 = vadd.f32 %v4382_v50, %v4348_v38  ;;  %v2308_v31 = vpack.c.bf16 %v2146_v58, %v2146_v58 }
 0x212   :  { %v2163_v41 = vmax.f32 %v2161_v34, %v2162_v9  ;;  %v2169_v56 = vrot.slane %v2168_v51, 4 }
 0x214   :  { %v2164_v8 = vrot.slane %v2163_v41, 2  ;;  %v2170_v37 = vmax.f32 %v2168_v51, %v2169_v56  ;;  %v4586_v56 = vpop.f32.mrf.mxu1 }
 0x216   :  { %v2165_v30 = vmax.f32 %v2163_v41, %v2164_v8  ;;  %v2171_v2 = vrot.slane %v2170_v37, 2  ;;  %v1688_v61 = vpop.f32.mrf.mxu0  ;;  %v1582_v41 = vadd.f32 %v4547_v12, %v1469_v43  ;;  %v4590_v12 = vpop.f32.mrf.mxu1 }
 0x217   :  { %v1689_v17 = vadd.f32 %v1688_v61, %v4492_v60 }
 0x218   :  { %v2166_v63 = vrot.slane %v2165_v30, 1  ;;  %v2172_v47 = vmax.f32 %v2170_v37, %v2171_v2  ;;  %v1690_v16 = vpop.f32.mrf.mxu0  ;;  %v4598_v36 = vpop.f32.mrf.mxu1 }
 0x219   :  { %v1691_v34 = vadd.f32 %v1690_v16, %v4497_v28  ;;  %v2050_v8 = vmax.f32 %v1689_v17, 0.0  ;;  %v2412_v16 = vunpack.c.l.b16 %v2309_v13  ;;  %v1473_v13 = vadd.f32 %v4393_v15, %v4346_v35 }
 0x21a   :  { %v2167_v9 = vmax.f32 %v2165_v30, %v2166_v63  ;;  %v2173_v51 = vrot.slane %v2172_v47, 1  ;;  %v1692_v11 = vpop.f32.mrf.mxu0  ;;  %v2411_v30 = vunpack.c.l.b16 %v2308_v31 }
 0x21b   :  { %v1693_v60 = vadd.f32 %v1692_v11, %v4504_v55  ;;  %v2051_v50 = vmax.f32 %v1691_v34, 0.0  ;;  %v2104_v17 = vmul.f32 %v4529_v20, %v2050_v8  ;;  %v3561_v11 = vld [vmem:[#allocation5 + $0xa8] sm:$0xff]  }
 0x21c   :  { %v2311_v53 = vpack.c.bf16 %v2167_v9, %v2167_v9  ;;  %v2174_v37 = vmax.f32 %v2172_v47, %v2173_v51  ;;  %v1694_v2 = vpop.f32.mrf.mxu0  ;;  %3307 = vmatpush3.bf16.msra.mxu0 %v3561_v11 }
 0x21d   :  { %v2053_v28 = vmax.f32 %v1693_v60, 0.0  ;;  %v1695_v58 = vadd.f32 %v1694_v2, %v1582_v41  ;;  %v2105_v34 = vmul.f32 %v4540_v0, %v2051_v50  ;;  %3308 = vmatprep.subr.bf16.mxu0 %v3650_v19 }
 0x21e   :  { %v2414_v61 = vunpack.c.l.b16 %v2311_v53  ;;  %v2312_v63 = vpack.c.bf16 %v2174_v37, %v2174_v37 }
 0x21f   :  { %v2107_v55 = vmul.f32 %v4534_v22, %v2053_v28  ;;  %v2054_v45 = vmax.f32 %v1695_v58, 0.0  ;;  %v1475_v28 = vadd.f32 %v4398_v10, %v4348_v38  ;;  %v1586_v58 = vadd.f32 %v4551_v1, %v1473_v13 }
 0x220   :  { %v2436_v47 = vsel %vm2435_vm7, %v2414_v61, %v2411_v30  ;;  %v2415_v43 = vunpack.c.l.b16 %v2312_v63  ;;  %v4600_v37 = vpop.f32.mrf.mxu1  ;;  %v1479_v10 = vadd.f32 %v4414_v25, %v4348_v38 }
 0x221   :  { %v2182_v9 = vmax.f32 %v2104_v17, %v2107_v55  ;;  %v2108_v51 = vmul.f32 %v4545_v32, %v2054_v45  ;;  %v1477_v55 = vadd.f32 %v4409_v24, %v4346_v35  ;;  %v1588_v45 = vadd.f32 %v4556_v39, %v1475_v28 }
 0x222   :  { %v2449_v31 = vsel %vm2435_vm7, %v2415_v43, %v2412_v16  ;;  %v4608_v63 = vpop.f32.mrf.mxu1  ;;  %v3562_v43 = vld [vmem:[#allocation5 + $0xa0] sm:$0xff]   ;;  %v1592_v24 = vadd.f32 %v4563_v21, %v1479_v10 }
 0x223   :  { %v2183_v41 = vrot.slane %v2182_v9, 4  ;;  %v2189_v60 = vmax.f32 %v2105_v34, %v2108_v51  ;;  %v1590_v1 = vadd.f32 %v4559_v48, %v1477_v55  ;;  %3309 = vmatpush3.bf16.msra.mxu0 %v3562_v43 }
 0x224   :  { %3310 = vmatprep.subr.bf16.mxu0 %v3650_v19 }
 0x225   :  { %v2184_v8 = vmax.f32 %v2182_v9, %v2183_v41  ;;  %v2190_v53 = vrot.slane %v2189_v60, 4 }
 0x227   :  { %v2185_v2 = vrot.slane %v2184_v8, 2  ;;  %v2191_v50 = vmax.f32 %v2189_v60, %v2190_v53  ;;  %v4616_v60 = vpop.f32.mrf.mxu1 }
 0x229   :  { %v2186_v30 = vmax.f32 %v2184_v8, %v2185_v2  ;;  %v2192_v61 = vrot.slane %v2191_v50, 2  ;;  %v1698_v17 = vpop.f32.mrf.mxu0 }
 0x22a   :  { %v1699_v16 = vadd.f32 %v1698_v17, %v1586_v58  ;;  %v3563_v17 = vld [vmem:[#allocation5 + $0x98] sm:$0xff]  }
 0x22b   :  { %v2187_v15 = vrot.slane %v2186_v30, 1  ;;  %v2193_v34 = vmax.f32 %v2191_v50, %v2192_v61  ;;  %v1700_v9 = vpop.f32.mrf.mxu0  ;;  %3311 = vmatpush3.bf16.msra.mxu0 %v3563_v17 }
 0x22c   :  { %v1701_v51 = vadd.f32 %v1700_v9, %v1588_v45  ;;  %v2056_v39 = vmax.f32 %v1699_v16, 0.0  ;;  %3312 = vmatprep.subr.bf16.mxu0 %v3650_v19 }
 0x22d   :  { %v2188_v11 = vmax.f32 %v2186_v30, %v2187_v15  ;;  %v2194_v41 = vrot.slane %v2193_v34, 1  ;;  %v1702_v8 = vpop.f32.mrf.mxu0  ;;  %v4620_v30 = vpop.f32.mrf.mxu1 }
 0x22e   :  { %v1703_v53 = vadd.f32 %v1702_v8, %v1590_v1  ;;  %v2057_v25 = vmax.f32 %v1701_v51, 0.0  ;;  %v2110_v55 = vmul.f32 %v4529_v20, %v2056_v39 }
 0x22f   :  { %v2314_v13 = vpack.c.bf16 %v2188_v11, %v2188_v11  ;;  %v2195_v2 = vmax.f32 %v2193_v34, %v2194_v41  ;;  %v1704_v50 = vpop.f32.mrf.mxu0  ;;  %v3564_v11 = vld [vmem:[#allocation5 + $0x90] sm:$0xff]  }
 0x230   :  { %v2059_v28 = vmax.f32 %v1703_v53, 0.0  ;;  %v1705_v48 = vadd.f32 %v1704_v50, %v1592_v24  ;;  %v2111_v34 = vmul.f32 %v4540_v0, %v2057_v25  ;;  %3313 = vmatpush3.bf16.msra.mxu0 %v3564_v11  ;;  %v3565_v24 = vld [vmem:[#allocation5 + $0x88] sm:$0xff]   ;;  %v1485_v25 = vadd.f32 %v4439_v27, %v4348_v38 }
 0x231   :  { %v2417_v58 = vunpack.c.l.b16 %v2314_v13  ;;  %v2315_v61 = vpack.c.bf16 %v2195_v2, %v2195_v2  ;;  %3314 = vmatprep.subr.bf16.mxu0 %v3650_v19  ;;  %v1483_v13 = vadd.f32 %v4428_v23, %v4346_v35  ;;  %v1487_v23 = vadd.f32 %v4454_v42, %v4346_v35 }
 0x232   :  { %v2113_v45 = vmul.f32 %v4534_v22, %v2059_v28  ;;  %v2060_v43 = vmax.f32 %v1705_v48, 0.0  ;;  %v1493_v42 = vadd.f32 %v4470_v3, %v4346_v35 }
 0x233   :  { %v4625_v21 = vsel %vm2437_vm14, %v2417_v58, %v2436_v47  ;;  %v2418_v16 = vunpack.c.l.b16 %v2315_v61  ;;  %v4627_v15 = vpop.f32.mrf.mxu1  ;;  %v1596_v28 = vadd.f32 %v4566_v57, %v1483_v13  ;;  %v3566_v58 = vld [vmem:[#allocation5 + $0x80] sm:$0xff]   ;;  %v1600_v11 = vadd.f32 %v4575_v26, %v1487_v23 }
 0x234   :  { %v2203_v9 = vmax.f32 %v2110_v55, %v2113_v45  ;;  %v2114_v10 = vmul.f32 %v4545_v32, %v2060_v43  ;;  %3315 = vmatpush3.bf16.msra.mxu0 %v3565_v24  ;;  %v1598_v45 = vadd.f32 %v4571_v14, %v1485_v25 }
 0x235   :  { %v4632_v1 = vpop.f32.mrf.mxu1  ;;  %v4635_v51 = vsel %vm2437_vm14, %v2418_v16, %v2449_v31  ;;  %3316 = vmatprep.subr.bf16.mxu0 %v3650_v19 }
 0x236   :  { %v2204_v41 = vrot.slane %v2203_v9, 4  ;;  %v2210_v47 = vmax.f32 %v2111_v34, %v2114_v10  ;;  %v1489_v10 = vadd.f32 %v4459_v59, %v4348_v38  ;;  %v1497_v59 = vadd.f32 %v4488_v54, %v4346_v35 }
 0x237   :  { %v4637_v8 = vpop.f32.mrf.mxu1 }
 0x238   :  { %v2205_v39 = vmax.f32 %v2203_v9, %v2204_v41  ;;  %v2211_v53 = vrot.slane %v2210_v47, 4  ;;  %3317 = vmatpush3.bf16.msra.mxu0 %v3566_v58 }
 0x239   :  { %v4643_v2 = vpop.f32.mrf.mxu1 }
 0x23a   :  { %v2206_v31 = vrot.slane %v2205_v39, 2  ;;  %v2212_v50 = vmax.f32 %v2210_v47, %v2211_v53  ;;  %v1602_v53 = vadd.f32 %v4577_v7, %v1489_v10  ;;  %v1606_v7 = vadd.f32 %v4579_v62, %v1493_v42 }
 0x23b   :  { %v3111_v48 = vpop.f32.mrf.mxu1 }
 0x23c   :  { %v2207_v61 = vmax.f32 %v2205_v39, %v2206_v31  ;;  %v2213_v17 = vrot.slane %v2212_v50, 2  ;;  %v1708_v55 = vpop.f32.mrf.mxu0  ;;  %v1495_v39 = vadd.f32 %v4472_v6, %v4348_v38  ;;  %v1499_v6 = vadd.f32 %v4495_v46, %v4348_v38 }
 0x23d   :  { %v1709_v43 = vadd.f32 %v1708_v55, %v1596_v28  ;;  %v3112_v16 = vpop.f32.mrf.mxu1 }
 0x23e   :  { %v2208_v34 = vrot.slane %v2207_v61, 1  ;;  %v2214_v9 = vmax.f32 %v2212_v50, %v2213_v17  ;;  %v4652_v27 = vadd.f32 %v3112_v16, %v3111_v48  ;;  %v1710_v57 = vpop.f32.mrf.mxu0  ;;  %v1608_v54 = vadd.f32 %v4586_v56, %v1495_v39 }
 0x23f   :  { %v1711_v41 = vadd.f32 %v1710_v57, %v1598_v45  ;;  %v3114_v47 = vpop.f32.mrf.mxu1  ;;  %v2062_v13 = vmax.f32 %v1709_v43, 0.0 }
 0x240   :  { %v2209_v19 = vmax.f32 %v2207_v61, %v2208_v34  ;;  %v2215_v14 = vrot.slane %v2214_v9, 1  ;;  %v1712_v24 = vpop.f32.mrf.mxu0 }
 0x241   :  { %v1713_v31 = vadd.f32 %v1712_v24, %v1600_v11  ;;  %v3115_v50 = vpop.f32.mrf.mxu1  ;;  %v2063_v3 = vmax.f32 %v1711_v41, 0.0  ;;  %v2116_v43 = vmul.f32 %v4529_v20, %v2062_v13  ;;  %v1610_v24 = vadd.f32 %v4590_v12, %v1497_v59 }
 0x242   :  { %v2317_v26 = vpack.c.bf16 %v2209_v19, %v2209_v19  ;;  %v2216_v25 = vmax.f32 %v2214_v9, %v2215_v14  ;;  %v4664_v28 = vadd.f32 %v3115_v50, %v3114_v47  ;;  %v1714_v48 = vpop.f32.mrf.mxu0  ;;  %v1503_v14 = vadd.f32 %v4502_v49, %v4346_v35 }
 0x243   :  { %v2065_v58 = vmax.f32 %v1713_v31, 0.0  ;;  %v1715_v61 = vadd.f32 %v1714_v48, %v1602_v53  ;;  %v3117_v17 = vpop.f32.mrf.mxu1  ;;  %v2117_v62 = vmul.f32 %v4540_v0, %v2063_v3  ;;  %v1612_v13 = vadd.f32 %v4598_v36, %v1499_v6 }
 0x244   :  { %v2420_v55 = vunpack.c.l.b16 %v2317_v26  ;;  %v2318_v23 = vpack.c.bf16 %v2216_v25, %v2216_v25  ;;  %v1718_v45 = vpop.f32.mrf.mxu0  ;;  %v1507_v25 = vadd.f32 %v4511_v33, %v4346_v35  ;;  %v1513_v36 = vadd.f32 %v4515_v4, %v4346_v35 }
 0x245   :  { %v2119_v16 = vmul.f32 %v4534_v22, %v2065_v58  ;;  %v2066_v34 = vmax.f32 %v1715_v61, 0.0  ;;  %v3118_v9 = vpop.f32.mrf.mxu1  ;;  %v1719_v10 = vadd.f32 %v1718_v45, %v1606_v7  ;;  %v1616_v6 = vadd.f32 %v4600_v37, %v1503_v14 }
 0x246   :  { %v2421_v57 = vunpack.c.l.b16 %v2318_v23  ;;  %v4672_v11 = vadd.f32 %v3118_v9, %v3117_v17  ;;  %v1720_v41 = vpop.f32.mrf.mxu0  ;;  %v4676_v46 = vsel %vm2439_vm6, %v2420_v55, %v4625_v21  ;;  %v1505_v21 = vadd.f32 %v4509_v29, %v4348_v38 }
 0x247   :  { %v2224_v47 = vmax.f32 %v2116_v43, %v2119_v16  ;;  %v2120_v56 = vmul.f32 %v4545_v32, %v2066_v34  ;;  %v1721_v42 = vadd.f32 %v1720_v41, %v1608_v54  ;;  %v3120_v19 = vpop.f32.mrf.mxu1  ;;  %v2068_v48 = vmax.f32 %v1719_v10, 0.0 }
 0x248   :  { %v1722_v39 = vpop.f32.mrf.mxu0  ;;  %v4685_v53 = vsel %vm2439_vm6, %v2421_v57, %v4635_v51  ;;  %v1509_v29 = vadd.f32 %v4513_v5, %v4348_v38  ;;  %v1618_v55 = vadd.f32 %v4608_v63, %v1505_v21  ;;  %v1515_v63 = vadd.f32 %v4517_v18, %v4348_v38 }
 0x249   :  { %v2225_v31 = vrot.slane %v2224_v47, 4  ;;  %v2231_v50 = vmax.f32 %v2117_v62, %v2120_v56  ;;  %v3121_v26 = vpop.f32.mrf.mxu1  ;;  %v1723_v49 = vadd.f32 %v1722_v39, %v1610_v24  ;;  %v2069_v51 = vmax.f32 %v1721_v42, 0.0 }
 0x24a   :  { %v4692_v3 = vadd.f32 %v3121_v26, %v3120_v19  ;;  %v1724_v12 = vpop.f32.mrf.mxu0  ;;  %v2122_v16 = vmul.f32 %v4529_v20, %v2068_v48  ;;  %v1622_v14 = vadd.f32 %v4620_v30, %v1509_v29  ;;  %v1626_v30 = vadd.f32 %v4627_v15, %v1513_v36 }
 0x24b   :  { %v2226_v59 = vmax.f32 %v2224_v47, %v2225_v31  ;;  %v2232_v58 = vrot.slane %v2231_v50, 4  ;;  %v1725_v61 = vadd.f32 %v1724_v12, %v1612_v13  ;;  %v3123_v17 = vpop.f32.mrf.mxu1  ;;  %v2071_v7 = vmax.f32 %v1723_v49, 0.0 }
 0x24c   :  { %v1728_v33 = vpop.f32.mrf.mxu0  ;;  %v2123_v37 = vmul.f32 %v4540_v0, %v2069_v51  ;;  %v1620_v47 = vadd.f32 %v4616_v60, %v1507_v25  ;;  %v1517_v31 = vadd.f32 %v4519_v44, %v4346_v35  ;;  %v1519_v29 = vadd.f32 %v4521_v40, %v4348_v38 }
 0x24d   :  { %v2227_v23 = vrot.slane %v2226_v59, 2  ;;  %v2233_v45 = vmax.f32 %v2231_v50, %v2232_v58  ;;  %v2072_v54 = vmax.f32 %v1725_v61, 0.0  ;;  %v3124_v43 = vpop.f32.mrf.mxu1  ;;  %v2125_v34 = vmul.f32 %v4534_v22, %v2071_v7 }
 0x24e   :  { %v1729_v9 = vadd.f32 %v1728_v33, %v1616_v6  ;;  %v4702_v57 = vadd.f32 %v3124_v43, %v3123_v17  ;;  %v1730_v5 = vpop.f32.mrf.mxu0  ;;  %v1628_v35 = vadd.f32 %v4632_v1, %v1515_v63  ;;  %v1630_v1 = vadd.f32 %v4637_v8, %v1517_v31 }
 0x24f   :  { %v2228_v10 = vmax.f32 %v2226_v59, %v2227_v23  ;;  %v2234_v4 = vrot.slane %v2233_v45, 2  ;;  %v2126_v41 = vmul.f32 %v4545_v32, %v2072_v54  ;;  %v4706_v62 = vpop.f32.mrf.mxu1  ;;  %v2245_v56 = vmax.f32 %v2122_v16, %v2125_v34 }
 0x250   :  { %v1731_v42 = vadd.f32 %v1730_v5, %v1618_v55  ;;  %v1732_v19 = vpop.f32.mrf.mxu0  ;;  %v2074_v26 = vmax.f32 %v1729_v9, 0.0 }
 0x251   :  { %v2229_v24 = vrot.slane %v2228_v10, 1  ;;  %v2235_v39 = vmax.f32 %v2233_v45, %v2234_v4  ;;  %v2252_v21 = vmax.f32 %v2123_v37, %v2126_v41  ;;  %v4712_v13 = vpop.f32.mrf.mxu1  ;;  %v2246_v50 = vrot.slane %v2245_v56, 4 }
 0x252   :  { %v1733_v48 = vadd.f32 %v1732_v19, %v1620_v47  ;;  %v1734_v49 = vpop.f32.mrf.mxu0  ;;  %v2075_v60 = vmax.f32 %v1731_v42, 0.0  ;;  %v2128_v55 = vmul.f32 %v4529_v20, %v2074_v26  ;;  %v1632_v47 = vadd.f32 %v4643_v2, %v1519_v29 }
 0x253   :  { %v2236_v18 = vrot.slane %v2235_v39, 1  ;;  %v2253_v12 = vrot.slane %v2252_v21, 4  ;;  %v1735_v25 = vadd.f32 %v1734_v49, %v1622_v14  ;;  %v4716_v59 = vpop.f32.mrf.mxu1  ;;  %v2230_v58 = vmax.f32 %v2228_v10, %v2229_v24 }
 0x254   :  { %v2247_v51 = vmax.f32 %v2245_v56, %v2246_v50  ;;  %v2077_v61 = vmax.f32 %v1733_v48, 0.0  ;;  %v1738_v17 = vpop.f32.mrf.mxu0  ;;  %v2129_v43 = vmul.f32 %v4540_v0, %v2075_v60 }
 0x255   :  { %v2254_v44 = vmax.f32 %v2252_v21, %v2253_v12  ;;  %v2078_v6 = vmax.f32 %v1735_v25, 0.0  ;;  %v4722_v7 = vpop.f32.mrf.mxu1  ;;  %v1739_v45 = vadd.f32 %v1738_v17, %v1626_v30  ;;  %v2237_v36 = vmax.f32 %v2235_v39, %v2236_v18 }
 0x256   :  { %v2248_v33 = vrot.slane %v2247_v51, 2  ;;  %v2131_v23 = vmul.f32 %v4534_v22, %v2077_v61  ;;  %v1740_v15 = vpop.f32.mrf.mxu0  ;;  %v2320_v16 = vpack.c.bf16 %v2230_v58, %v2230_v58 }
 0x257   :  { %v2255_v54 = vrot.slane %v2254_v44, 2  ;;  %v2132_v38 = vmul.f32 %v4545_v32, %v2078_v6  ;;  %v4728_v40 = vpop.f32.mrf.mxu1  ;;  %v2080_v37 = vmax.f32 %v1739_v45, 0.0  ;;  %v1741_v41 = vadd.f32 %v1740_v15, %v1628_v35 }
 0x258   :  { %v2249_v34 = vmax.f32 %v2247_v51, %v2248_v33  ;;  %v2266_v9 = vmax.f32 %v2128_v55, %v2131_v23  ;;  %v1742_v5 = vpop.f32.mrf.mxu0  ;;  %v2321_v24 = vpack.c.bf16 %v2237_v36, %v2237_v36  ;;  %v2423_v12 = vunpack.c.l.b16 %v2320_v16 }
 0x259   :  { %v2256_v10 = vmax.f32 %v2254_v44, %v2255_v54  ;;  %v2273_v4 = vmax.f32 %v2129_v43, %v2132_v38  ;;  %v4731_v63 = vpop.f32.mrf.mxu1  ;;  %v1743_v19 = vadd.f32 %v1742_v5, %v1630_v1  ;;  %v2081_v21 = vmax.f32 %v1741_v41, 0.0 }
 0x25a   :  { %v2250_v56 = vrot.slane %v2249_v34, 1  ;;  %v2267_v42 = vrot.slane %v2266_v9, 4  ;;  %v1744_v14 = vpop.f32.mrf.mxu0  ;;  %v2134_v2 = vmul.f32 %v4529_v20, %v2080_v37  ;;  %v2424_v35 = vunpack.c.l.b16 %v2321_v24 }
 0x25b   :  { %v2257_v39 = vrot.slane %v2256_v10, 1  ;;  %v2274_v8 = vrot.slane %v2273_v4, 4  ;;  %v4734_v31 = vpop.f32.mrf.mxu1  ;;  %v2083_v48 = vmax.f32 %v1743_v19, 0.0  ;;  %v1745_v49 = vadd.f32 %v1744_v14, %v1632_v47 }
 0x25c   :  { %v2251_v50 = vmax.f32 %v2249_v34, %v2250_v56  ;;  %v2268_v26 = vmax.f32 %v2266_v9, %v2267_v42  ;;  %v4736_v18 = vpop.f32.mrf.mxu0  ;;  %v2135_v33 = vmul.f32 %v4540_v0, %v2081_v21  ;;  %v2442_v38 = vsel %vm2441_vm3, %v2423_v12, %v4676_v46 }
 0x25d   :  { %v2258_v60 = vmax.f32 %v2256_v10, %v2257_v39  ;;  %v2275_v25 = vmax.f32 %v2273_v4, %v2274_v8  ;;  %v4739_v30 = vpop.f32.mrf.mxu1  ;;  %v2137_v61 = vmul.f32 %v4534_v22, %v2083_v48  ;;  %v2084_v17 = vmax.f32 %v1745_v49, 0.0 }
 0x25e   :  { %v2323_v58 = vpack.c.bf16 %v2251_v50, %v2251_v50  ;;  %v2269_v51 = vrot.slane %v2268_v26, 2  ;;  %v4742_v29 = vpop.f32.mrf.mxu0 }
 0x25f   :  { %v2324_v44 = vpack.c.bf16 %v2258_v60, %v2258_v60  ;;  %v2276_v6 = vrot.slane %v2275_v25, 2  ;;  %v4745_v55 = vpop.f32.mrf.mxu1  ;;  %v2287_v15 = vmax.f32 %v2134_v2, %v2137_v61  ;;  %v2138_v20 = vmul.f32 %v4545_v32, %v2084_v17 }
 0x260   :  { %v2426_v23 = vunpack.c.l.b16 %v2323_v58  ;;  %v2270_v45 = vmax.f32 %v2268_v26, %v2269_v51  ;;  %v4748_v36 = vpop.f32.mrf.mxu0  ;;  %v2452_v32 = vsel %vm2441_vm3, %v2424_v35, %v4685_v53 }
 0x261   :  { %v2427_v54 = vunpack.c.l.b16 %v2324_v44  ;;  %v2277_v43 = vmax.f32 %v2275_v25, %v2276_v6  ;;  %v4750_v22 = vpop.f32.mrf.mxu1  ;;  %v2288_v16 = vrot.slane %v2287_v15, 4  ;;  %v2294_v34 = vmax.f32 %v2135_v33, %v2138_v20 }
 0x262   :  { %v2271_v1 = vrot.slane %v2270_v45, 1  ;;  %v4754_v0 = vpop.f32.mrf.mxu0  ;;  %v2444_v10 = vsel %vm2443_vm10, %v2426_v23, %v2442_v38 }
 0x263   :  { %v2278_v9 = vrot.slane %v2277_v43, 1  ;;  %v4756_v5 = vpop.f32.mrf.mxu1  ;;  %v2289_v37 = vmax.f32 %v2287_v15, %v2288_v16  ;;  %v2295_v41 = vrot.slane %v2294_v34, 4  ;;  %v2453_v46 = vsel %vm2443_vm10, %v2427_v54, %v2452_v32 }
 0x264   :  { %v2272_v4 = vmax.f32 %v2270_v45, %v2271_v1  ;;  %v3181_v47 = vpop.f32.mrf.mxu0  ;;  %v763_v1 = vsub.s32 2, %v4321_v52 }
 0x265   :  { %v2279_v56 = vmax.f32 %v2277_v43, %v2278_v9  ;;  %v4761_v42 = vpop.f32.mrf.mxu1  ;;  %v2290_v14 = vrot.slane %v2289_v37, 2  ;;  %v2296_v24 = vmax.f32 %v2294_v34, %v2295_v41 }
 0x266   :  { %v2326_v19 = vpack.c.bf16 %v2272_v4, %v2272_v4  ;;  %v3182_v39 = vpop.f32.mrf.mxu0 }
 0x267   :  { %v4764_v8 = vpop.f32.mrf.mxu1  ;;  %v2327_v21 = vpack.c.bf16 %v2279_v56, %v2279_v56  ;;  %v2291_v26 = vmax.f32 %v2289_v37, %v2290_v14  ;;  %v2297_v53 = vrot.slane %v2296_v24, 2  ;;  %v3571_v56 = vld [vmem:[%s4894_s2] sm:$0x7]  ;;  %v3183_v52 = vadd.f32 %v3182_v39, %v3181_v47 }
 0x268   :  { %v2429_v50 = vunpack.c.l.b16 %v2326_v19  ;;  %v3184_v48 = vpop.f32.mrf.mxu0 }
 0x269   :  { %v4766_v49 = vpop.f32.mrf.mxu1  ;;  %v2430_v12 = vunpack.c.l.b16 %v2327_v21  ;;  %v2292_v60 = vrot.slane %v2291_v26, 1  ;;  %v2298_v25 = vmax.f32 %v2296_v24, %v2297_v53 }
 0x26a   :  { %v3185_v2 = vpop.f32.mrf.mxu0  ;;  %v2446_v58 = vsel %vm2445_vm2, %v2429_v50, %v2444_v10  ;;  %v3177_v50 = vadd.f32 %v4742_v29, %v4736_v18  ;;  %v3131_v18 = vadd.f32 %v4722_v7, %v4716_v59  ;;  %v3180_v29 = vadd.f32 %v4754_v0, %v4748_v36 }
 0x26b   :  { %v4769_v51 = vpop.f32.mrf.mxu1  ;;  %v2454_v61 = vsel %vm2445_vm2, %v2430_v12, %v2453_v46  ;;  %v2293_v17 = vmax.f32 %v2291_v26, %v2292_v60  ;;  %v2299_v35 = vrot.slane %v2298_v25, 1  ;;  %v4792_v46 = vrot.slane %v3571_v56, %v763_v1 }
 0x26c   :  { %v3187_v44 = vpop.f32.mrf.mxu0  ;;  %v3186_v60 = vadd.f32 %v3185_v2, %v3184_v48 }
 0x26d   :  { %v4772_v6 = vpop.f32.mrf.mxu1  ;;  %v2329_v33 = vpack.c.bf16 %v2293_v17, %v2293_v17  ;;  %v2300_v45 = vmax.f32 %v2298_v25, %v2299_v35  ;;  %v1790_v21 = vadd.f32 %v4672_v11, %v4792_v46  ;;  %v1782_v12 = vadd.f32 %v4652_v27, %v4792_v46 }
 0x26e   :  { %v3188_v23 = vpop.f32.mrf.mxu0  ;;  %v1793_v25 = vadd.f32 %v4692_v3, %v4792_v46  ;;  %v3134_v27 = vadd.f32 %v4731_v63, %v4728_v40  ;;  %v1785_v3 = vadd.f32 %v4664_v28, %v4792_v46  ;;  %v3137_v28 = vadd.f32 %v4739_v30, %v4734_v31 }
 0x26f   :  { %v4774_v15 = vpop.f32.mrf.mxu1  ;;  %v2432_v20 = vunpack.c.l.b16 %v2329_v33  ;;  %v2330_v43 = vpack.c.bf16 %v2300_v45, %v2300_v45  ;;  %v1887_v39 = vadd.f32 %v3183_v52, %v1790_v21  ;;  %v1879_v35 = vadd.f32 %v3177_v50, %v1782_v12 }
 0x270   :  { %v4776_v54 = vpop.f32.mrf.mxu0  ;;  %v3189_v7 = vadd.f32 %v3188_v23, %v3187_v44  ;;  %v1806_v45 = vadd.f32 %v3131_v18, %v4792_v46  ;;  %v1882_v63 = vadd.f32 %v3180_v29, %v1785_v3  ;;  %v1809_v1 = vadd.f32 %v3134_v27, %v4792_v46  ;;  %v4830_v44 = vld [vmem:[%s4895_s3 + $0x10] sm:$0xff]  ;;  %v4835_v23 = vld [vmem:[%s4895_s3 + $0x28] sm:$0xff] }
 0x271   :  { %v4778_v38 = vpop.f32.mrf.mxu1  ;;  %v2433_v34 = vunpack.c.l.b16 %v2330_v43  ;;  %v2448_v9 = vsel %vm2447_vm4, %v2432_v20, %v2446_v58  ;;  %v3128_v58 = vadd.f32 %v4712_v13, %v4706_v62  ;;  %v1890_v62 = vadd.f32 %v3186_v60, %v1793_v25 }
 0x272   :  { %v4781_v16 = vpop.f32.mrf.mxu0  ;;  %v2463_v14 = vpack.c.b16 %v2448_v9, %v2448_v9  ;;  %v1798_v13 = vadd.f32 %v4702_v57, %v4792_v46  ;;  %v3143_v57 = vadd.f32 %v4761_v42, %v4756_v5  ;;  %v3146_v31 = vadd.f32 %v4766_v49, %v4764_v8 }
 0x273   :  { %v4784_v10 = vpop.f32.mrf.mxu1  ;;  %v2455_v4 = vsel %vm2447_vm4, %v2433_v34, %v2454_v61  ;;  %v1801_v59 = vadd.f32 %v3128_v58, %v4792_v46  ;;  %v3140_v34 = vadd.f32 %v4750_v22, %v4745_v55  ;;  %v3149_v5 = vadd.f32 %v4772_v6, %v4769_v51 }
 0x274   :  { %v3193_v32 = vpop.f32.mrf.mxu0  ;;  %v2464_v41 = vpack.c.b16 %v2455_v4, %v2455_v4  ;;  %v1895_v56 = vadd.f32 %v3189_v7, %v1798_v13  ;;  %v3192_v52 = vadd.f32 %v4781_v16, %v4776_v54  ;;  %v1814_v49 = vadd.f32 %v3137_v28, %v4792_v46 }
 0x275   :  { %v4787_v37 = vpop.f32.mrf.mxu1  ;;  %v1817_v50 = vadd.f32 %v3140_v34, %v4792_v46  ;;  %v1822_v12 = vadd.f32 %v3143_v57, %v4792_v46  ;;  %v3152_v25 = vadd.f32 %v4778_v38, %v4774_v15  ;;  %v4854_v29 = vadd.f32 %v3149_v5, %v4792_v46 }
 0x276   :  { %v3194_v19 = vpop.f32.mrf.mxu0  ;;  %2645 = vmatprep.mubr.bf16.mxu1 %v2464_v41 }
 0x277   :  { %v4794_v24 = vpop.f32.mrf.mxu1  ;;  %2646 = vmatmul.mubr.bf16.vlgmr.msra.gmra.mxu1 %v2463_v14  ;;  %v3195_v36 = vadd.f32 %v3194_v19, %v3193_v32  ;;  %v4857_v38 = vadd.f32 %v3152_v25, %v4792_v46 }
 0x278   :  { %v3196_v26 = vpop.f32.mrf.mxu0 }
 0x279   :  { %v4800_v53 = vpop.f32.mrf.mxu1  ;;  %v1903_v4 = vadd.f32 %v3195_v36, %v1806_v45 }
 0x27a   :  { %v3197_v47 = vpop.f32.mrf.mxu0 }
 0x27b   :  { %v3288_v11 = vpop.f32.mrf.mxu1  ;;  %v3198_v42 = vadd.f32 %v3197_v47, %v3196_v26 }
 0x27c   :  { %v1984_v61 = vadd.f32 %v3288_v11, %v1887_v39  ;;  %v3199_v17 = vpop.f32.mrf.mxu0  ;;  %v1825_v39 = vadd.f32 %v3146_v31, %v4792_v46 }
 0x27d   :  { %v1975_v48 = vpop.f32.mrf.mxu1  ;;  %v1906_v11 = vadd.f32 %v3198_v42, %v1809_v1 }
 0x27e   :  { %v1976_v2 = vadd.f32 %v1975_v48, %v1879_v35  ;;  %v3200_v33 = vpop.f32.mrf.mxu0  ;;  %v2046_v20 = vmax.f32 %v1984_v61, 0.0  ;;  %v1898_v48 = vadd.f32 %v3192_v52, %v1801_v59 }
 0x27f   :  { %v3289_v0 = vpop.f32.mrf.mxu1  ;;  %v3201_v3 = vadd.f32 %v3200_v33, %v3199_v17 }
 0x280   :  { %v1987_v43 = vadd.f32 %v3289_v0, %v1890_v62  ;;  %v3202_v40 = vpop.f32.mrf.mxu0  ;;  %v2040_v30 = vmax.f32 %v1976_v2, 0.0  ;;  %v2100_v19 = vmul.f32 %v4830_v44, %v2046_v20 }
 0x281   :  { %v1978_v9 = vpop.f32.mrf.mxu1 }
 0x282   :  { %v2049_v32 = vmax.f32 %v1987_v43, 0.0  ;;  %v1979_v55 = vadd.f32 %v1978_v9, %v1882_v63  ;;  %v3203_v22 = vpop.f32.mrf.mxu0  ;;  %v2094_v26 = vmul.f32 %v4830_v44, %v2040_v30  ;;  %v1911_v30 = vadd.f32 %v3201_v3, %v1814_v49 }
 0x283   :  { %v3292_v41 = vpop.f32.mrf.mxu1  ;;  %v3204_v43 = vadd.f32 %v3203_v22, %v3202_v40 }
 0x284   :  { %v2103_v14 = vmul.f32 %v4835_v23, %v2049_v32  ;;  %v2043_v21 = vmax.f32 %v1979_v55, 0.0  ;;  %v3205_v8 = vpop.f32.mrf.mxu0  ;;  %v2000_v51 = vadd.f32 %v3292_v41, %v1903_v4  ;;  %v3155_v41 = vadd.f32 %v4787_v37, %v4784_v10 }
 0x285   :  { %v1991_v6 = vpop.f32.mrf.mxu1  ;;  %v3158_v37 = vadd.f32 %v4800_v53, %v4794_v24 }
 0x286   :  { %v2175_v60 = vmax.f32 %v2100_v19, %v2103_v14  ;;  %v2097_v47 = vmul.f32 %v4835_v23, %v2043_v21  ;;  %v1992_v54 = vadd.f32 %v1991_v6, %v1895_v56  ;;  %v3206_v16 = vpop.f32.mrf.mxu0  ;;  %v2058_v2 = vmax.f32 %v2000_v51, 0.0 }
 0x287   :  { %v3207_v58 = vadd.f32 %v3206_v16, %v3205_v8  ;;  %v3293_v18 = vpop.f32.mrf.mxu1  ;;  %v1914_v14 = vadd.f32 %v3204_v43, %v1817_v50  ;;  %v1838_v10 = vadd.f32 %v3155_v41, %v4792_v46 }
 0x288   :  { %v2176_v61 = vrot.slane %v2175_v60, 4  ;;  %v2154_v35 = vmax.f32 %v2094_v26, %v2097_v47  ;;  %v3208_v27 = vpop.f32.mrf.mxu0  ;;  %v2003_v62 = vadd.f32 %v3293_v18, %v1906_v11  ;;  %v2052_v45 = vmax.f32 %v1992_v54, 0.0 }
 0x289   :  { %v1994_v13 = vpop.f32.mrf.mxu1  ;;  %v1919_v7 = vadd.f32 %v3207_v58, %v1822_v12  ;;  %v2112_v9 = vmul.f32 %v4830_v44, %v2058_v2 }
 0x28a   :  { %v2177_v36 = vmax.f32 %v2175_v60, %v2176_v61  ;;  %v2155_v0 = vrot.slane %v2154_v35, 4  ;;  %v1995_v20 = vadd.f32 %v1994_v13, %v1898_v48  ;;  %v3209_v15 = vpop.f32.mrf.mxu0  ;;  %v2061_v63 = vmax.f32 %v2003_v62, 0.0 }
 0x28b   :  { %v3210_v1 = vadd.f32 %v3209_v15, %v3208_v27  ;;  %v3296_v28 = vpop.f32.mrf.mxu1  ;;  %v2106_v4 = vmul.f32 %v4830_v44, %v2052_v45 }
 0x28c   :  { %v2178_v34 = vrot.slane %v2177_v36, 2  ;;  %v2156_v57 = vmax.f32 %v2154_v35, %v2155_v0  ;;  %v2055_v59 = vmax.f32 %v1995_v20, 0.0  ;;  %v2016_v17 = vadd.f32 %v3296_v28, %v1919_v7  ;;  %v3211_v33 = vpop.f32.mrf.mxu0 }
 0x28d   :  { %v2115_v31 = vmul.f32 %v4835_v23, %v2061_v63  ;;  %v2007_v32 = vpop.f32.mrf.mxu1  ;;  %v1922_v55 = vadd.f32 %v3210_v1, %v1825_v39 }
 0x28e   :  { %v2179_v5 = vmax.f32 %v2177_v36, %v2178_v34  ;;  %v2157_v42 = vrot.slane %v2156_v57, 2  ;;  %v2109_v40 = vmul.f32 %v4835_v23, %v2055_v59  ;;  %v3212_v22 = vpop.f32.mrf.mxu0  ;;  %v2008_v52 = vadd.f32 %v2007_v32, %v1911_v30 }
 0x28f   :  { %v2217_v56 = vmax.f32 %v2112_v9, %v2115_v31  ;;  %v3297_v19 = vpop.f32.mrf.mxu1  ;;  %v2070_v49 = vmax.f32 %v2016_v17, 0.0  ;;  %v3213_v60 = vadd.f32 %v3212_v22, %v3211_v33  ;;  %v1841_v22 = vadd.f32 %v3158_v37, %v4792_v46 }
 0x290   :  { %v2180_v21 = vrot.slane %v2179_v5, 1  ;;  %v2158_v8 = vmax.f32 %v2156_v57, %v2157_v42  ;;  %v2196_v12 = vmax.f32 %v2106_v4, %v2109_v40  ;;  %v3214_v51 = vpop.f32.mrf.mxu0  ;;  %v2064_v26 = vmax.f32 %v2008_v52, 0.0 }
 0x291   :  { %v2218_v6 = vrot.slane %v2217_v56, 4  ;;  %v2019_v47 = vadd.f32 %v3297_v19, %v1922_v55  ;;  %v2010_v54 = vpop.f32.mrf.mxu1  ;;  %v2124_v13 = vmul.f32 %v4830_v44, %v2070_v49  ;;  %v1927_v36 = vadd.f32 %v3213_v60, %v4854_v29 }
 0x292   :  { %v2181_v16 = vmax.f32 %v2179_v5, %v2180_v21  ;;  %v2159_v39 = vrot.slane %v2158_v8, 1  ;;  %v2197_v25 = vrot.slane %v2196_v12, 4  ;;  %v2011_v58 = vadd.f32 %v2010_v54, %v1914_v14  ;;  %v3215_v11 = vpop.f32.mrf.mxu0 }
 0x293   :  { %v2073_v50 = vmax.f32 %v2019_v47, 0.0  ;;  %v3216_v18 = vadd.f32 %v3215_v11, %v3214_v51  ;;  %v3300_v61 = vpop.f32.mrf.mxu1  ;;  %v2219_v62 = vmax.f32 %v2217_v56, %v2218_v6  ;;  %v2118_v24 = vmul.f32 %v4830_v44, %v2064_v26 }
 0x294   :  { %v2313_v35 = vpack.c.bf16 %v2181_v16, %v2181_v16  ;;  %v2160_v27 = vmax.f32 %v2158_v8, %v2159_v39  ;;  %v2198_v48 = vmax.f32 %v2196_v12, %v2197_v25  ;;  %v2067_v3 = vmax.f32 %v2011_v58, 0.0  ;;  %v3217_v2 = vpop.f32.mrf.mxu0 }
 0x295   :  { %v2127_v7 = vmul.f32 %v4835_v23, %v2073_v50  ;;  %v2023_v0 = vpop.f32.mrf.mxu1  ;;  %v1930_v34 = vadd.f32 %v3216_v18, %v4857_v38  ;;  %v2220_v41 = vrot.slane %v2219_v62, 2 }
 0x296   :  { %v2310_v45 = vpack.c.bf16 %v2160_v27, %v2160_v27  ;;  %v2199_v20 = vrot.slane %v2198_v48, 2  ;;  %v2121_v53 = vmul.f32 %v4835_v23, %v2067_v3  ;;  %v3218_v15 = vpop.f32.mrf.mxu0  ;;  %v2024_v63 = vadd.f32 %v2023_v0, %v1927_v36 }
 0x297   :  { %v2259_v43 = vmax.f32 %v2124_v13, %v2127_v7  ;;  %v3219_v1 = vadd.f32 %v3218_v15, %v3217_v2  ;;  %v3301_v28 = vpop.f32.mrf.mxu1  ;;  %v2416_v57 = vunpack.c.l.b16 %v2313_v35  ;;  %v2221_v26 = vmax.f32 %v2219_v62, %v2220_v41  ;;  %v3070_v41 = vld [vmem:[%s4897_s5] ss:$0 sm:$0xff] }
 0x298   :  { %v2413_v59 = vunpack.c.l.b16 %v2310_v45  ;;  %v2200_v17 = vmax.f32 %v2198_v48, %v2199_v20  ;;  %v2238_v33 = vmax.f32 %v2118_v24, %v2121_v53  ;;  %v3220_v9 = vpop.f32.mrf.mxu0  ;;  %v2076_v31 = vmax.f32 %v2024_v63, 0.0 }
 0x299   :  { %v2260_v29 = vrot.slane %v2259_v43, 4  ;;  %v1935_v30 = vadd.f32 %v3219_v1, %v1838_v10  ;;  %v2026_v32 = vpop.f32.mrf.mxu1  ;;  %v2222_v10 = vrot.slane %v2221_v26, 1 }
 0x29a   :  { %v2456_v55 = vsel %vm2435_vm7, %v2416_v57, %v2413_v59  ;;  %v2201_v5 = vrot.slane %v2200_v17, 1  ;;  %v2239_v42 = vrot.slane %v2238_v33, 4  ;;  %v2027_v4 = vadd.f32 %v2026_v32, %v1930_v34  ;;  %v3221_v40 = vpop.f32.mrf.mxu0 }
 0x29b   :  { %v2261_v56 = vmax.f32 %v2259_v43, %v2260_v29  ;;  %v2032_v38 = vadd.f32 %v3300_v61, %v1935_v30  ;;  %v3222_v21 = vadd.f32 %v3221_v40, %v3220_v9  ;;  %v2130_v8 = vmul.f32 %v4830_v44, %v2076_v31 }
 0x29c   :  { %v2202_v52 = vmax.f32 %v2200_v17, %v2201_v5  ;;  %v2240_v19 = vmax.f32 %v2238_v33, %v2239_v42  ;;  %v2079_v14 = vmax.f32 %v2027_v4, 0.0  ;;  %v2223_v2 = vmax.f32 %v2221_v26, %v2222_v10 }
 0x29d   :  { %v1938_v6 = vadd.f32 %v3222_v21, %v1841_v22  ;;  %v2262_v60 = vrot.slane %v2261_v56, 2  ;;  %v2082_v47 = vmax.f32 %v2032_v38, 0.0 }
 0x29e   :  { %v2316_v12 = vpack.c.bf16 %v2202_v52, %v2202_v52  ;;  %v2241_v49 = vrot.slane %v2240_v19, 2  ;;  %v2133_v51 = vmul.f32 %v4835_v23, %v2079_v14  ;;  %v2319_v20 = vpack.c.bf16 %v2223_v2, %v2223_v2 }
 0x29f   :  { %v2035_v39 = vadd.f32 %v3301_v28, %v1938_v6  ;;  %v2263_v50 = vmax.f32 %v2261_v56, %v2262_v60  ;;  %v2136_v18 = vmul.f32 %v4830_v44, %v2082_v47 }
 0x2a0   :  { %v2419_v54 = vunpack.c.l.b16 %v2316_v12  ;;  %v2242_v16 = vmax.f32 %v2240_v19, %v2241_v49  ;;  %v2280_v46 = vmax.f32 %v2130_v8, %v2133_v51  ;;  %v2422_v1 = vunpack.c.l.b16 %v2319_v20 }
 0x2a1   :  { %v2085_v11 = vmax.f32 %v2035_v39, 0.0  ;;  %v2264_v62 = vrot.slane %v2263_v50, 1 }
 0x2a2   :  { %v2457_v25 = vsel %vm2437_vm14, %v2419_v54, %v2456_v55  ;;  %v2281_v58 = vrot.slane %v2280_v46, 4  ;;  %v2243_v37 = vrot.slane %v2242_v16, 1 }
 0x2a3   :  { %v2139_v35 = vmul.f32 %v4835_v23, %v2085_v11  ;;  %v2265_v24 = vmax.f32 %v2263_v50, %v2264_v62  ;;  %v2458_v34 = vsel %vm2439_vm6, %v2422_v1, %v2457_v25 }
 0x2a4   :  { %v2282_v61 = vmax.f32 %v2280_v46, %v2281_v58  ;;  %v2244_v3 = vmax.f32 %v2242_v16, %v2243_v37 }
 0x2a5   :  { %v2301_v48 = vmax.f32 %v2136_v18, %v2139_v35  ;;  %v2325_v28 = vpack.c.bf16 %v2265_v24, %v2265_v24 }
 0x2a6   :  { %v2283_v27 = vrot.slane %v2282_v61, 2  ;;  %v2322_v45 = vpack.c.bf16 %v2244_v3, %v2244_v3 }
 0x2a7   :  { %v2302_v7 = vrot.slane %v2301_v48, 4  ;;  %v2428_v33 = vunpack.c.l.b16 %v2325_v28 }
 0x2a8   :  { %v2284_v13 = vmax.f32 %v2282_v61, %v2283_v27  ;;  %v2425_v63 = vunpack.c.l.b16 %v2322_v45 }
 0x2a9   :  { %v2303_v0 = vmax.f32 %v2301_v48, %v2302_v7 }
 0x2aa   :  { %v2285_v36 = vrot.slane %v2284_v13, 1  ;;  %v2459_v59 = vsel %vm2441_vm3, %v2425_v63, %v2458_v34 }
 0x2ab   :  { %v2304_v15 = vrot.slane %v2303_v0, 2  ;;  %v2460_v31 = vsel %vm2443_vm10, %v2428_v33, %v2459_v59 }
 0x2ac   :  { %v2286_v53 = vmax.f32 %v2284_v13, %v2285_v36 }
 0x2ad   :  { %v2305_v43 = vmax.f32 %v2303_v0, %v2304_v15 }
 0x2ae   :  { %v2328_v44 = vpack.c.bf16 %v2286_v53, %v2286_v53 }
 0x2af   :  { %v2306_v23 = vrot.slane %v2305_v43, 1 }
 0x2b0   :  { %v2431_v17 = vunpack.c.l.b16 %v2328_v44 }
 0x2b1   :  { %v2307_v57 = vmax.f32 %v2305_v43, %v2306_v23 }
 0x2b2   :  { %v2461_v30 = vsel %vm2445_vm2, %v2431_v17, %v2460_v31 }
 0x2b3   :  { %v2331_v9 = vpack.c.bf16 %v2307_v57, %v2307_v57 }
 0x2b5   :  { %v2434_v29 = vunpack.c.l.b16 %v2331_v9 }
 0x2b7   :  { %v2462_v32 = vsel %vm2447_vm4, %v2434_v29, %v2461_v30 }
 0x2b8   :  { %v2465_v55 = vpack.c.b16 %v2462_v32, %v2462_v32 }
 0x2ba   :  { %3319 = vmatmul.mubr.bf16.vlgmr.msra.gmra.mxu0 %v2465_v55 }
 0x337   :  { %v3255_v5 = vpop.f32.mrf.mxu1 }
 0x339   :  { %v3256_v42 = vpop.f32.mrf.mxu1 }
 0x33a   :  { %v3257_v22 = vadd.f32 %v3256_v42, %v3255_v5 }
 0x33b   :  { %v3258_v4 = vpop.f32.mrf.mxu1 }
 0x33c   :  { %v2648_v56 = vadd.f32 %v3257_v22, %v3070_v41 }
 0x33d   :  { %v3259_v40 = vpop.f32.mrf.mxu1 }
 0x37a   :  { %v2687_v38 = vpop.f32.mrf.mxu0 }
 0x37b   :  { %v2688_v52 = vadd.f32 %v2687_v38, %v2648_v56 }
 0x37c   :  { %v3320_v19 = vpop.f32.mrf.mxu0 }
 0x37d   :  { %2693 = vst [vmem:[#allocation7] sm:$0xff] %v2688_v52 }
 0x37e   :  { %v2690_v14 = vpop.f32.mrf.mxu0 }
 0x37f   :  { %3623 = shalt.err (!%p3620_p0)
}
 0x380   :  { %2703 = dma.vmem_to_hbm [thread:$0]  %s2701_s13, 128, %s4898_s6, [#allocation4]   ;;  %v3321_v21 = vpop.f32.mrf.mxu0 }
 0x381   :  { %3636 = dma.done.wait [#allocation4], 128  }
 0x382   :  { %3637 = vsyncadd [#allocation4], 4294967168 }
 0x383   :  { %2707 = vsyncpa [#allocation3], 1 }
 0x384   :  { %2708 = vsyncpa [#allocation6], 1 }
 0x385   :  { %2709 = vsyncpa [#allocation4], 1 }

</bundles_post_ra>
